<compile_context>
chip_gen: v5e
topology: v5e:2x2
jax: 0.10.0
libtpu: 0.0.40
codegen_flags: <defaults>
</compile_context>

<pallas_src>
import jax
import jax.numpy as jnp
from jax.experimental import pallas as pl
from jax.experimental.pallas import tpu as pltpu


_POOL_TILE = 512                      # pooled rows per grid step (4x patch rows/block)
_VMEM_LIMIT = 32 * 1024 * 1024        # explicit scoped-VMEM budget (safe on v5e/v6e/v7x)


def _round_up(n, m):
    return ((n + m - 1) // m) * m


def _vmem():
    return pl.BlockSpec(memory_space=pltpu.MemorySpace.VMEM)


# ---------------- Pallas kernels ----------------

def conv_relu_pool_kernel(p_ref, w_ref, b_ref, o_ref):
    """One conv + bias + relu + 2x2 max-pool stage as a single im2col matmul.

    p_ref : (4*T, K) bf16 phase-stacked patches for this row tile.  Rows
            [ph*T, (ph+1)*T) hold pooling phase `ph` of the same T pooled output
            positions -> one matmul, then a phase-max over row blocks.
    w_ref : (K, C) bf16 flattened conv weight, row order (kh, kw, cin).
    b_ref : (1, C) f32 bias.
    o_ref : (T, C) bf16 pooled activations (row order (b, i, j), channels minor).
    """
    t = p_ref.shape[0] // 4
    y = jnp.dot(p_ref[...], w_ref[...], preferred_element_type=jnp.float32)
    y = jnp.maximum(y + b_ref[...], 0.0)          # bias broadcast once, relu in f32
    pooled = jnp.maximum(jnp.maximum(y[0:t], y[t:2 * t]),
                         jnp.maximum(y[2 * t:3 * t], y[3 * t:4 * t]))
    o_ref[...] = pooled.astype(o_ref.dtype)


def mlp_softmax_kernel(x_ref, w1, b1, w2, b2, w3, b3, w4, b4, o_ref):
    """dense1->relu->dense2->relu->dense3->relu->out->softmax(dim=1), fused."""
    def dense(h, w_ref_, b_ref_):
        return jnp.dot(h.astype(w_ref_.dtype), w_ref_[...],
                       preferred_element_type=jnp.float32) + b_ref_[...]

    h = jnp.maximum(dense(x_ref[...], w1, b1), 0.0)
    h = jnp.maximum(dense(h, w2, b2), 0.0)
    h = jnp.maximum(dense(h, w3, b3), 0.0)
    logits = dense(h, w4, b4)
    m = jnp.max(logits, axis=1, keepdims=True)
    e = jnp.exp(logits - m)
    s = jnp.sum(e, axis=1, keepdims=True)
    o_ref[...] = e * pl.reciprocal(s, approx=True)   # EUP reciprocal + VPU multiply


# ---------------- conv stage wrapper ----------------

def _conv_stage(x_nhwc, w_oihw, b, ksize):
    """conv(kxk, stride 1, valid) + relu + maxpool(2,2) as one tiled pallas_call.

    Returns (pooled (B*ph*pw, cout) bf16 with row order (b, i, j), (ph, pw)).
    """
    B, H, W, Cin = x_nhwc.shape
    cout = w_oihw.shape[0]
    oh, ow = H - ksize + 1, W - ksize + 1
    ph, pw = oh // 2, ow // 2
    K = ksize * ksize * Cin
    N = B * ph * pw                                   # pooled output rows
    tile = min(_POOL_TILE, _round_up(N, 16))          # multiple of 16 (bf16 sublane tile)
    Np = _round_up(N, tile)                           # pad rows so grid divides evenly

    # im2col at trace time (XLA glue); patch column order (kh, kw, cin).
    patches = jnp.concatenate(
        [x_nhwc[:, kh:kh + oh, kw:kw + ow, :]
         for kh in range(ksize) for kw in range(ksize)],
        axis=-1)                                      # (B, oh, ow, K)

    # Four 2x2/stride-2 pooling phases, each (N, K), zero-padded to Np rows.
    phase_mats = []
    for e1 in range(2):
        for e2 in range(2):
            p = patches[:, e1:e1 + 2 * ph:2, e2:e2 + 2 * pw:2, :].reshape(N, K)
            phase_mats.append(jnp.pad(p, ((0, Np - N), (0, 0))))
    A = jnp.stack(phase_mats, axis=0)                 # (4, Np, K)
    # Interleave per row tile so each grid block holds all 4 phases of its rows:
    # global row index = ((tile_idx*4 + phase)*tile + r).
    A = (A.reshape(4, Np // tile, tile, K)
           .transpose(1, 0, 2, 3)
           .reshape(4 * Np, K)
           .astype(jnp.bfloat16))

    wf = jnp.transpose(w_oihw, (2, 3, 1, 0)).reshape(K, cout).astype(jnp.bfloat16)
    bf = b.reshape(1, cout).astype(jnp.float32)

    out = pl.pallas_call(
        conv_relu_pool_kernel,
        out_shape=jax.ShapeDtypeStruct((Np, cout), jnp.bfloat16),
        grid=(Np // tile,),
        in_specs=[
            pl.BlockSpec((4 * tile, K), lambda i: (i, 0)),   # patch row tile
            pl.BlockSpec((K, cout), lambda i: (0, 0)),       # weights (resident)
            pl.BlockSpec((1, cout), lambda i: (0, 0)),       # bias (resident)
        ],
        out_specs=pl.BlockSpec((tile, cout), lambda i: (i, 0)),
        compiler_params=pltpu.CompilerParams(
            dimension_semantics=("parallel",),               # megacore on v7x
            vmem_limit_bytes=_VMEM_LIMIT),
    )(A, wf, bf)
    return out[:N], (ph, pw)


# ---------------- full forward ----------------

def number_network_forward(x_nchw, params):
    B = x_nchw.shape[0]
    c1 = params["conv1_w"].shape[0]
    c2 = params["conv2_w"].shape[0]
    x = jnp.transpose(x_nchw, (0, 2, 3, 1)).astype(jnp.float32)   # NHWC

    # ---- conv1 (5x5, 1->20) + relu + maxpool 2x2 ----
    y1, (ph1, pw1) = _conv_stage(x, params["conv1_w"], params["conv1_b"], 5)
    # TODO(synk): F.dropout2d(p=0.2) is stochastic under torch's default
    # training=True; implemented as identity (inference semantics).
    y1 = y1.reshape(B, ph1, pw1, c1)                              # free row-major reshape

    # ---- conv2 (3x3, 20->15) + relu + maxpool 2x2 ----
    y2, (ph2, pw2) = _conv_stage(y1, params["conv2_w"], params["conv2_b"], 3)
    # TODO(synk): second F.dropout2d(p=0.2) also treated as identity.

    # y2 rows are (b, i, j) with channels minor, i.e. (h, w, c) flatten order.
    # torch flattens (c, h, w); instead of transposing the activation we permute
    # dense1's input rows once at trace time (no XLA transpose on the data path).
    nfeat = c2 * ph2 * pw2
    flat = y2.reshape(B, nfeat)                                   # free reshape (bf16)
    d1 = params["dense1_w"]                                       # (140, c*h*w)
    w1p = (d1.reshape(d1.shape[0], c2, ph2 * pw2)
             .transpose(2, 1, 0)
             .reshape(nfeat, d1.shape[0]))                        # ((h,w,c)-order, 140)

    bf16 = jnp.bfloat16
    f32 = jnp.float32
    out = pl.pallas_call(
        mlp_softmax_kernel,
        out_shape=jax.ShapeDtypeStruct((B, params["out_w"].shape[0]), jnp.float32),
        in_specs=[_vmem()] * 9,
        out_specs=_vmem(),
        compiler_params=pltpu.CompilerParams(vmem_limit_bytes=_VMEM_LIMIT),
    )(flat,
      w1p.astype(bf16), params["dense1_b"].reshape(1, -1).astype(f32),
      params["dense2_w"].T.astype(bf16), params["dense2_b"].reshape(1, -1).astype(f32),
      params["dense3_w"].T.astype(bf16), params["dense3_b"].reshape(1, -1).astype(f32),
      params["out_w"].T.astype(bf16), params["out_b"].reshape(1, -1).astype(f32))
    return out


def init_params(key):
    """Deterministic synthetic parameters with torch-default shapes (O,I,KH,KW / out,in)."""
    ks = jax.random.split(key, 12)

    def u(k, shape, fan_in):
        bound = 1.0 / jnp.sqrt(jnp.float32(fan_in))
        return jax.random.uniform(k, shape, jnp.float32, -bound, bound)

    return {
        "conv1_w": u(ks[0], (20, 1, 5, 5), 25),
        "conv1_b": u(ks[1], (20,), 25),
        "conv2_w": u(ks[2], (15, 20, 3, 3), 180),
        "conv2_b": u(ks[3], (15,), 180),
        "dense1_w": u(ks[4], (140, 375), 375),
        "dense1_b": u(ks[5], (140,), 375),
        "dense2_w": u(ks[6], (100, 140), 140),
        "dense2_b": u(ks[7], (100,), 140),
        "dense3_w": u(ks[8], (54, 100), 100),
        "dense3_b": u(ks[9], (54,), 100),
        "out_w": u(ks[10], (9, 54), 54),
        "out_b": u(ks[11], (9,), 54),
    }


if __name__ == "__main__":
    key = jax.random.PRNGKey(0)
    pkey, xkey = jax.random.split(key)
    params = init_params(pkey)

    # 28x28x1 input is dictated by the architecture (two conv+pool stages -> 5x5x15).
    x = jax.random.normal(xkey, (2, 1, 28, 28), jnp.float32)

    probs = jax.jit(number_network_forward)(x, params)
    probs = jax.block_until_ready(probs)

    assert probs.shape == (2, 9)
    # bf16 MXU operands + approximate-reciprocal softmax => relaxed tolerance.
    assert bool(jnp.allclose(jnp.sum(probs, axis=1), 1.0, atol=5e-3))
    print("KERNEL_OK")
</pallas_src>

<mosaic_0001>
module attributes {stable_mosaic.version = 11 : i64} {
  func.func @conv_relu_pool_kernel(%arg0: i32, %arg1: memref<1152x25xbf16, #tpu.memory_space<vmem>>, %arg2: memref<25x20xbf16, #tpu.memory_space<vmem>>, %arg3: memref<1x20xf32, #tpu.memory_space<vmem>>, %arg4: memref<288x20xbf16, #tpu.memory_space<vmem>>) attributes {dimension_semantics = [#tpu.dimension_semantics<parallel>], iteration_bounds = array<i64: 1>, scalar_prefetch = 0 : i64, scratch_operands = 0 : i64, tpu.core_type = #tpu.core_type<tc>, window_params = [{transform_indices = @transform_0, window_bounds = array<i64: 1152, 25>}, {pipeline_mode = #tpu.pipeline_mode<synchronous>, transform_indices = @transform_1, window_bounds = array<i64: 25, 20>}, {pipeline_mode = #tpu.pipeline_mode<synchronous>, transform_indices = @transform_2, window_bounds = array<i64: 1, 20>}, {transform_indices = @transform_3, window_bounds = array<i64: 288, 20>}]} {
    %c0 = arith.constant 0 : index
    %c0_0 = arith.constant 0 : index
    %0 = vector.load %arg1[%c0, %c0_0] : memref<1152x25xbf16, #tpu.memory_space<vmem>>, vector<1152x25xbf16>
    %c0_1 = arith.constant 0 : index
    %c0_2 = arith.constant 0 : index
    %1 = vector.load %arg2[%c0_1, %c0_2] : memref<25x20xbf16, #tpu.memory_space<vmem>>, vector<25x20xbf16>
    %cst = arith.constant dense<0.000000e+00> : vector<1152x20xf32>
    %2 = tpu.matmul %0, %1, %cst {dimension_numbers = #tpu.dot_dimension_numbers<[1], [0], [0], [1], [0, 0, 1, 1], [], []>} : vector<1152x25xbf16>, vector<25x20xbf16>, vector<1152x20xf32> -> vector<1152x20xf32>
    %c0_3 = arith.constant 0 : index
    %c0_4 = arith.constant 0 : index
    %3 = vector.load %arg3[%c0_3, %c0_4] : memref<1x20xf32, #tpu.memory_space<vmem>>, vector<1x20xf32>
    %4 = vector.broadcast %3 : vector<1x20xf32> to vector<1152x20xf32>
    %5 = arith.addf %2, %4 : vector<1152x20xf32>
    %cst_5 = arith.constant 0.000000e+00 : f32
    %6 = vector.broadcast %cst_5 : f32 to vector<1152x20xf32>
    %7 = arith.maximumf %5, %6 : vector<1152x20xf32>
    %8 = vector.extract_strided_slice %7 {offsets = [0, 0], sizes = [288, 20], strides = [1, 1]} : vector<1152x20xf32> to vector<288x20xf32>
    %9 = vector.extract_strided_slice %7 {offsets = [288, 0], sizes = [288, 20], strides = [1, 1]} : vector<1152x20xf32> to vector<288x20xf32>
    %10 = arith.maximumf %8, %9 : vector<288x20xf32>
    %11 = vector.extract_strided_slice %7 {offsets = [576, 0], sizes = [288, 20], strides = [1, 1]} : vector<1152x20xf32> to vector<288x20xf32>
    %12 = vector.extract_strided_slice %7 {offsets = [864, 0], sizes = [288, 20], strides = [1, 1]} : vector<1152x20xf32> to vector<288x20xf32>
    %13 = arith.maximumf %11, %12 : vector<288x20xf32>
    %14 = arith.maximumf %10, %13 : vector<288x20xf32>
    %15 = arith.truncf %14 : vector<288x20xf32> to vector<288x20xbf16>
    %c0_6 = arith.constant 0 : index
    %c0_7 = arith.constant 0 : index
    %16 = vector.load %arg4[%c0_6, %c0_7] : memref<288x20xbf16, #tpu.memory_space<vmem>>, vector<288x20xbf16>
    tpu.vector_store %arg4[%c0_6, %c0_7], %15 {strides = array<i32>} : memref<288x20xbf16, #tpu.memory_space<vmem>>, vector<288x20xbf16>,
    return
  }
  func.func @transform_0(%arg0: i32) -> (i32, i32) {
    %c0_i32 = arith.constant 0 : i32
    %c0_i32_0 = arith.constant 0 : i32
    return %arg0, %c0_i32 : i32, i32
  }
  func.func @transform_1(%arg0: i32) -> (i32, i32) {
    %c0_i32 = arith.constant 0 : i32
    %c0_i32_0 = arith.constant 0 : i32
    %c0_i32_1 = arith.constant 0 : i32
    return %c0_i32, %c0_i32_0 : i32, i32
  }
  func.func @transform_2(%arg0: i32) -> (i32, i32) {
    %c0_i32 = arith.constant 0 : i32
    %c0_i32_0 = arith.constant 0 : i32
    %c0_i32_1 = arith.constant 0 : i32
    return %c0_i32, %c0_i32_0 : i32, i32
  }
  func.func @transform_3(%arg0: i32) -> (i32, i32) {
    %c0_i32 = arith.constant 0 : i32
    %c0_i32_0 = arith.constant 0 : i32
    return %arg0, %c0_i32 : i32, i32
  }
}

module attributes {stable_mosaic.version = 11 : i64} {
  func.func @conv_relu_pool_kernel(%arg0: i32, %arg1: memref<256x180xbf16, #tpu.memory_space<vmem>>, %arg2: memref<180x15xbf16, #tpu.memory_space<vmem>>, %arg3: memref<1x15xf32, #tpu.memory_space<vmem>>, %arg4: memref<64x15xbf16, #tpu.memory_space<vmem>>) attributes {dimension_semantics = [#tpu.dimension_semantics<parallel>], iteration_bounds = array<i64: 1>, scalar_prefetch = 0 : i64, scratch_operands = 0 : i64, tpu.core_type = #tpu.core_type<tc>, window_params = [{transform_indices = @transform_0, window_bounds = array<i64: 256, 180>}, {pipeline_mode = #tpu.pipeline_mode<synchronous>, transform_indices = @transform_1, window_bounds = array<i64: 180, 15>}, {pipeline_mode = #tpu.pipeline_mode<synchronous>, transform_indices = @transform_2, window_bounds = array<i64: 1, 15>}, {transform_indices = @transform_3, window_bounds = array<i64: 64, 15>}]} {
    %c0 = arith.constant 0 : index
    %c0_0 = arith.constant 0 : index
    %0 = vector.load %arg1[%c0, %c0_0] : memref<256x180xbf16, #tpu.memory_space<vmem>>, vector<256x180xbf16>
    %c0_1 = arith.constant 0 : index
    %c0_2 = arith.constant 0 : index
    %1 = vector.load %arg2[%c0_1, %c0_2] : memref<180x15xbf16, #tpu.memory_space<vmem>>, vector<180x15xbf16>
    %cst = arith.constant dense<0.000000e+00> : vector<256x15xf32>
    %2 = tpu.matmul %0, %1, %cst {dimension_numbers = #tpu.dot_dimension_numbers<[1], [0], [0], [1], [0, 0, 1, 1], [], []>} : vector<256x180xbf16>, vector<180x15xbf16>, vector<256x15xf32> -> vector<256x15xf32>
    %c0_3 = arith.constant 0 : index
    %c0_4 = arith.constant 0 : index
    %3 = vector.load %arg3[%c0_3, %c0_4] : memref<1x15xf32, #tpu.memory_space<vmem>>, vector<1x15xf32>
    %4 = vector.broadcast %3 : vector<1x15xf32> to vector<256x15xf32>
    %5 = arith.addf %2, %4 : vector<256x15xf32>
    %cst_5 = arith.constant 0.000000e+00 : f32
    %6 = vector.broadcast %cst_5 : f32 to vector<256x15xf32>
    %7 = arith.maximumf %5, %6 : vector<256x15xf32>
    %8 = vector.extract_strided_slice %7 {offsets = [0, 0], sizes = [64, 15], strides = [1, 1]} : vector<256x15xf32> to vector<64x15xf32>
    %9 = vector.extract_strided_slice %7 {offsets = [64, 0], sizes = [64, 15], strides = [1, 1]} : vector<256x15xf32> to vector<64x15xf32>
    %10 = arith.maximumf %8, %9 : vector<64x15xf32>
    %11 = vector.extract_strided_slice %7 {offsets = [128, 0], sizes = [64, 15], strides = [1, 1]} : vector<256x15xf32> to vector<64x15xf32>
    %12 = vector.extract_strided_slice %7 {offsets = [192, 0], sizes = [64, 15], strides = [1, 1]} : vector<256x15xf32> to vector<64x15xf32>
    %13 = arith.maximumf %11, %12 : vector<64x15xf32>
    %14 = arith.maximumf %10, %13 : vector<64x15xf32>
    %15 = arith.truncf %14 : vector<64x15xf32> to vector<64x15xbf16>
    %c0_6 = arith.constant 0 : index
    %c0_7 = arith.constant 0 : index
    %16 = vector.load %arg4[%c0_6, %c0_7] : memref<64x15xbf16, #tpu.memory_space<vmem>>, vector<64x15xbf16>
    tpu.vector_store %arg4[%c0_6, %c0_7], %15 {strides = array<i32>} : memref<64x15xbf16, #tpu.memory_space<vmem>>, vector<64x15xbf16>,
    return
  }
  func.func @transform_0(%arg0: i32) -> (i32, i32) {
    %c0_i32 = arith.constant 0 : i32
    %c0_i32_0 = arith.constant 0 : i32
    return %arg0, %c0_i32 : i32, i32
  }
  func.func @transform_1(%arg0: i32) -> (i32, i32) {
    %c0_i32 = arith.constant 0 : i32
    %c0_i32_0 = arith.constant 0 : i32
    %c0_i32_1 = arith.constant 0 : i32
    return %c0_i32, %c0_i32_0 : i32, i32
  }
  func.func @transform_2(%arg0: i32) -> (i32, i32) {
    %c0_i32 = arith.constant 0 : i32
    %c0_i32_0 = arith.constant 0 : i32
    %c0_i32_1 = arith.constant 0 : i32
    return %c0_i32, %c0_i32_0 : i32, i32
  }
  func.func @transform_3(%arg0: i32) -> (i32, i32) {
    %c0_i32 = arith.constant 0 : i32
    %c0_i32_0 = arith.constant 0 : i32
    return %arg0, %c0_i32 : i32, i32
  }
}

module attributes {stable_mosaic.version = 11 : i64} {
  func.func @mlp_softmax_kernel(%arg0: memref<2x375xbf16, #tpu.memory_space<vmem>>, %arg1: memref<375x140xbf16, #tpu.memory_space<vmem>>, %arg2: memref<1x140xf32, #tpu.memory_space<vmem>>, %arg3: memref<140x100xbf16, #tpu.memory_space<vmem>>, %arg4: memref<1x100xf32, #tpu.memory_space<vmem>>, %arg5: memref<100x54xbf16, #tpu.memory_space<vmem>>, %arg6: memref<1x54xf32, #tpu.memory_space<vmem>>, %arg7: memref<54x9xbf16, #tpu.memory_space<vmem>>, %arg8: memref<1x9xf32, #tpu.memory_space<vmem>>, %arg9: memref<2x9xf32, #tpu.memory_space<vmem>>) attributes {dimension_semantics = [], scalar_prefetch = 0 : i64, scratch_operands = 0 : i64, tpu.core_type = #tpu.core_type<tc>} {
    %c0 = arith.constant 0 : index
    %c0_0 = arith.constant 0 : index
    %0 = vector.load %arg0[%c0, %c0_0] : memref<2x375xbf16, #tpu.memory_space<vmem>>, vector<2x375xbf16>
    %c0_1 = arith.constant 0 : index
    %c0_2 = arith.constant 0 : index
    %1 = vector.load %arg1[%c0_1, %c0_2] : memref<375x140xbf16, #tpu.memory_space<vmem>>, vector<375x140xbf16>
    %cst = arith.constant dense<0.000000e+00> : vector<2x140xf32>
    %2 = tpu.matmul %0, %1, %cst {dimension_numbers = #tpu.dot_dimension_numbers<[1], [0], [0], [1], [0, 0, 1, 1], [], []>} : vector<2x375xbf16>, vector<375x140xbf16>, vector<2x140xf32> -> vector<2x140xf32>
    %c0_3 = arith.constant 0 : index
    %c0_4 = arith.constant 0 : index
    %3 = vector.load %arg2[%c0_3, %c0_4] : memref<1x140xf32, #tpu.memory_space<vmem>>, vector<1x140xf32>
    %4 = vector.broadcast %3 : vector<1x140xf32> to vector<2x140xf32>
    %5 = arith.addf %2, %4 : vector<2x140xf32>
    %cst_5 = arith.constant 0.000000e+00 : f32
    %6 = vector.broadcast %cst_5 : f32 to vector<2x140xf32>
    %7 = arith.maximumf %5, %6 : vector<2x140xf32>
    %8 = arith.truncf %7 : vector<2x140xf32> to vector<2x140xbf16>
    %c0_6 = arith.constant 0 : index
    %c0_7 = arith.constant 0 : index
    %9 = vector.load %arg3[%c0_6, %c0_7] : memref<140x100xbf16, #tpu.memory_space<vmem>>, vector<140x100xbf16>
    %cst_8 = arith.constant dense<0.000000e+00> : vector<2x100xf32>
    %10 = tpu.matmul %8, %9, %cst_8 {dimension_numbers = #tpu.dot_dimension_numbers<[1], [0], [0], [1], [0, 0, 1, 1], [], []>} : vector<2x140xbf16>, vector<140x100xbf16>, vector<2x100xf32> -> vector<2x100xf32>
    %c0_9 = arith.constant 0 : index
    %c0_10 = arith.constant 0 : index
    %11 = vector.load %arg4[%c0_9, %c0_10] : memref<1x100xf32, #tpu.memory_space<vmem>>, vector<1x100xf32>
    %12 = vector.broadcast %11 : vector<1x100xf32> to vector<2x100xf32>
    %13 = arith.addf %10, %12 : vector<2x100xf32>
    %cst_11 = arith.constant 0.000000e+00 : f32
    %14 = vector.broadcast %cst_11 : f32 to vector<2x100xf32>
    %15 = arith.maximumf %13, %14 : vector<2x100xf32>
    %16 = arith.truncf %15 : vector<2x100xf32> to vector<2x100xbf16>
    %c0_12 = arith.constant 0 : index
    %c0_13 = arith.constant 0 : index
    %17 = vector.load %arg5[%c0_12, %c0_13] : memref<100x54xbf16, #tpu.memory_space<vmem>>, vector<100x54xbf16>
    %cst_14 = arith.constant dense<0.000000e+00> : vector<2x54xf32>
    %18 = tpu.matmul %16, %17, %cst_14 {dimension_numbers = #tpu.dot_dimension_numbers<[1], [0], [0], [1], [0, 0, 1, 1], [], []>} : vector<2x100xbf16>, vector<100x54xbf16>, vector<2x54xf32> -> vector<2x54xf32>
    %c0_15 = arith.constant 0 : index
    %c0_16 = arith.constant 0 : index
    %19 = vector.load %arg6[%c0_15, %c0_16] : memref<1x54xf32, #tpu.memory_space<vmem>>, vector<1x54xf32>
    %20 = vector.broadcast %19 : vector<1x54xf32> to vector<2x54xf32>
    %21 = arith.addf %18, %20 : vector<2x54xf32>
    %cst_17 = arith.constant 0.000000e+00 : f32
    %22 = vector.broadcast %cst_17 : f32 to vector<2x54xf32>
    %23 = arith.maximumf %21, %22 : vector<2x54xf32>
    %24 = arith.truncf %23 : vector<2x54xf32> to vector<2x54xbf16>
    %c0_18 = arith.constant 0 : index
    %c0_19 = arith.constant 0 : index
    %25 = vector.load %arg7[%c0_18, %c0_19] : memref<54x9xbf16, #tpu.memory_space<vmem>>, vector<54x9xbf16>
    %cst_20 = arith.constant dense<0.000000e+00> : vector<2x9xf32>
    %26 = tpu.matmul %24, %25, %cst_20 {dimension_numbers = #tpu.dot_dimension_numbers<[1], [0], [0], [1], [0, 0, 1, 1], [], []>} : vector<2x54xbf16>, vector<54x9xbf16>, vector<2x9xf32> -> vector<2x9xf32>
    %c0_21 = arith.constant 0 : index
    %c0_22 = arith.constant 0 : index
    %27 = vector.load %arg8[%c0_21, %c0_22] : memref<1x9xf32, #tpu.memory_space<vmem>>, vector<1x9xf32>
    %28 = vector.broadcast %27 : vector<1x9xf32> to vector<2x9xf32>
    %29 = arith.addf %26, %28 : vector<2x9xf32>
    %cst_23 = arith.constant dense<0xFF800000> : vector<2xf32>
    %30 = vector.multi_reduction <maximumf>, %29, %cst_23 [1] : vector<2x9xf32> to vector<2xf32>
    %31 = vector.shape_cast %30 : vector<2xf32> to vector<2x1xf32>
    %32 = vector.broadcast %31 : vector<2x1xf32> to vector<2x9xf32>
    %33 = arith.subf %29, %32 : vector<2x9xf32>
    %34 = math.exp %33 : vector<2x9xf32>
    %cst_24 = arith.constant dense<0.000000e+00> : vector<2xf32>
    %35 = vector.multi_reduction <add>, %34, %cst_24 [1] : vector<2x9xf32> to vector<2xf32>
    %36 = vector.shape_cast %35 : vector<2xf32> to vector<2x1xf32>
    %37 = tpu.reciprocal %36 {approx = true} : vector<2x1xf32> -> vector<2x1xf32>
    %38 = vector.broadcast %37 : vector<2x1xf32> to vector<2x9xf32>
    %39 = arith.mulf %34, %38 : vector<2x9xf32>
    %c0_25 = arith.constant 0 : index
    %c0_26 = arith.constant 0 : index
    %40 = vector.load %arg9[%c0_25, %c0_26] : memref<2x9xf32, #tpu.memory_space<vmem>>, vector<2x9xf32>
    tpu.vector_store %arg9[%c0_25, %c0_26], %39 {strides = array<i32>} : memref<2x9xf32, #tpu.memory_space<vmem>>, vector<2x9xf32>,
    return
  }
}

</mosaic_0001>

<bundles_post_ra>
// kernel: number_network_forward.3
= control target key start
LH: loop header
LB: loop body
LE: loop exit
PB: predicated region body
PF: predicated region fallthrough
CT: control target
= control target key end

     0   :  { %vm755_vm0 = vcmask 1043456   ;;  %vm756_vm1 = vcmask 1044480   ;;  %v1911_v2 = vmov 65535   ;;  %vm538_vm2 = vcmask 203776   ;;  %s2527_s1 = inlined_call_operand.vmem [shape: bf16[25,20], index: 1, kind: input, shape index: {}]   ;;  %s2528_s2 = inlined_call_operand.vmem [shape: f32[1,20], index: 2, kind: input, shape index: {}]   ;;  %s2529_s0 = inlined_call_operand.vmem [shape: bf16[1152,25], index: 0, kind: input, shape index: {}]   ;;  %s2530_s3 = inlined_call_operand.vmem [shape: bf16[288,20], index: 3, kind: output, shape index: {}]  }
   0x1   :  { %v1754_v0 = vld [vmem:[%s2527_s1 + $0x8] sm:$0xf]  ;;  %v1901_v1 = vld [vmem:[%s2527_s1 + $0x8] sm:$0x10]  ;;  %v757_v3 = vsel %vm755_vm0, 4294967295, %v1911_v2  ;;  %v1900_v7 = vld [vmem:[%s2527_s1] sm:$0xff] }
   0x2   :  { %v1755_v4 = vor.u32 %v1901_v1, %v1754_v0  ;;  %v758_v5 = vsel %vm756_vm1, %v757_v3, 0  ;;  %v1828_v8 = vld [vmem:[%s2529_s0] sm:$0xff]  ;;  %v1846_v9 = vld [vmem:[%s2529_s0 + $0x90] sm:$0xff]  ;;  %v1829_v12 = vld [vmem:[%s2529_s0 + $0x8] sm:$0xff]  ;;  %vm1419_vm3 = vcmask 158720  }
   0x3   :  { %v1864_v10 = vld [vmem:[%s2529_s0 + $0x120] sm:$0xff]  ;;  %v1882_v11 = vld [vmem:[%s2529_s0 + $0x1b0] sm:$0xff]  ;;  %v1847_v13 = vld [vmem:[%s2529_s0 + $0x98] sm:$0xff] }
   0x4   :  { %v760_v6 = vand.u32 %v1755_v4, %v758_v5  ;;  %v1865_v14 = vld [vmem:[%s2529_s0 + $0x128] sm:$0xff]  ;;  %v1883_v15 = vld [vmem:[%s2529_s0 + $0x1b8] sm:$0xff]  ;;  %v1830_v16 = vld [vmem:[%s2529_s0 + $0x10] sm:$0xff] }
   0x5   :  { %v1848_v17 = vld [vmem:[%s2529_s0 + $0xa0] sm:$0xff]  ;;  %v1866_v18 = vld [vmem:[%s2529_s0 + $0x130] sm:$0xff]  ;;  %v1831_v20 = vld [vmem:[%s2529_s0 + $0x18] sm:$0xff] }
   0x6   :  { %768 = vmatpush.bf16.msra.mxu0 %v760_v6  ;;  %1902 = vmatpush.bf16.msra.mxu1 %v760_v6  ;;  %v1884_v19 = vld [vmem:[%s2529_s0 + $0x1c0] sm:$0xff]  ;;  %v1849_v21 = vld [vmem:[%s2529_s0 + $0xa8] sm:$0xff]  ;;  %v1867_v22 = vld [vmem:[%s2529_s0 + $0x138] sm:$0xff] }
   0x7   :  { %1903 = vmatpush.bf16.msra.mxu2 %v760_v6  ;;  %1904 = vmatpush.bf16.msra.mxu3 %v760_v6  ;;  %v1885_v23 = vld [vmem:[%s2529_s0 + $0x1c8] sm:$0xff]  ;;  %v1832_v24 = vld [vmem:[%s2529_s0 + $0x20] sm:$0xff]  ;;  %v1850_v25 = vld [vmem:[%s2529_s0 + $0xb0] sm:$0xff] }
   0x8   :  { %v1868_v26 = vld [vmem:[%s2529_s0 + $0x140] sm:$0xff]  ;;  %v1886_v27 = vld [vmem:[%s2529_s0 + $0x1d0] sm:$0xff]  ;;  %v1833_v28 = vld [vmem:[%s2529_s0 + $0x28] sm:$0xff] }
   0x9   :  { %v1851_v29 = vld [vmem:[%s2529_s0 + $0xb8] sm:$0xff]  ;;  %v1869_v30 = vld [vmem:[%s2529_s0 + $0x148] sm:$0xff]  ;;  %v1834_v32 = vld [vmem:[%s2529_s0 + $0x30] sm:$0xff] }
   0xa   :  { %769 = vmatpush.bf16.msra.mxu0 %v1900_v7  ;;  %1905 = vmatpush.bf16.msra.mxu1 %v1900_v7  ;;  %v1887_v31 = vld [vmem:[%s2529_s0 + $0x1d8] sm:$0xff]  ;;  %v1852_v33 = vld [vmem:[%s2529_s0 + $0xc0] sm:$0xff]  ;;  %v1870_v34 = vld [vmem:[%s2529_s0 + $0x150] sm:$0xff] }
   0xb   :  { %1906 = vmatpush.bf16.msra.mxu2 %v1900_v7  ;;  %1907 = vmatpush.bf16.msra.mxu3 %v1900_v7  ;;  %v1888_v35 = vld [vmem:[%s2529_s0 + $0x1e0] sm:$0xff]  ;;  %v1835_v36 = vld [vmem:[%s2529_s0 + $0x38] sm:$0xff]  ;;  %v1853_v37 = vld [vmem:[%s2529_s0 + $0xc8] sm:$0xff] }
   0xc   :  { %v1871_v38 = vld [vmem:[%s2529_s0 + $0x158] sm:$0xff]  ;;  %v1889_v39 = vld [vmem:[%s2529_s0 + $0x1e8] sm:$0xff]  ;;  %v2072_v40 = vld [vmem:[%s2528_s2] ss:$0 sm:$0xff] }
   0xd   :  { %1756 = vmatmul.msk.bf16.vlgmr.msra.gmra.mxu0 %vm538_vm2, %v1828_v8  ;;  %1774 = vmatmul.msk.bf16.vlgmr.msra.gmra.mxu1 %vm538_vm2, %v1846_v9  ;;  %v1836_v41 = vld [vmem:[%s2529_s0 + $0x40] sm:$0xff]  ;;  %v1854_v42 = vld [vmem:[%s2529_s0 + $0xd0] sm:$0xff]  ;;  %v1837_v3 = vld [vmem:[%s2529_s0 + $0x48] sm:$0xff] }
   0xe   :  { %1792 = vmatmul.msk.bf16.vlgmr.msra.gmra.mxu2 %vm538_vm2, %v1864_v10  ;;  %1810 = vmatmul.msk.bf16.vlgmr.msra.gmra.mxu3 %vm538_vm2, %v1882_v11  ;;  %v1872_v45 = vld [vmem:[%s2529_s0 + $0x160] sm:$0xff]  ;;  %v1890_v46 = vld [vmem:[%s2529_s0 + $0x1f0] sm:$0xff]  ;;  %v1855_v4 = vld [vmem:[%s2529_s0 + $0xd8] sm:$0xff] }
   0xf   :  { %v1873_v11 = vld [vmem:[%s2529_s0 + $0x168] sm:$0xff] }
  0x1d   :  { %1757 = vmatmul.msk.bf16.gmra.mxu0 %vm538_vm2, %v1829_v12  ;;  %1775 = vmatmul.msk.bf16.gmra.mxu1 %vm538_vm2, %v1847_v13  ;;  %v1891_v12 = vld [vmem:[%s2529_s0 + $0x1f8] sm:$0xff] }
  0x1e   :  { %1793 = vmatmul.msk.bf16.gmra.mxu2 %vm538_vm2, %v1865_v14  ;;  %1811 = vmatmul.msk.bf16.gmra.mxu3 %vm538_vm2, %v1883_v15 }
  0x2d   :  { %1758 = vmatmul.msk.bf16.gmra.mxu0 %vm538_vm2, %v1830_v16  ;;  %1776 = vmatmul.msk.bf16.gmra.mxu1 %vm538_vm2, %v1848_v17 }
  0x2e   :  { %1794 = vmatmul.msk.bf16.gmra.mxu2 %vm538_vm2, %v1866_v18  ;;  %1812 = vmatmul.msk.bf16.gmra.mxu3 %vm538_vm2, %v1884_v19 }
  0x3d   :  { %1759 = vmatmul.msk.bf16.gmra.mxu0 %vm538_vm2, %v1831_v20  ;;  %1777 = vmatmul.msk.bf16.gmra.mxu1 %vm538_vm2, %v1849_v21 }
  0x3e   :  { %1795 = vmatmul.msk.bf16.gmra.mxu2 %vm538_vm2, %v1867_v22  ;;  %1813 = vmatmul.msk.bf16.gmra.mxu3 %vm538_vm2, %v1885_v23 }
  0x4d   :  { %1760 = vmatmul.msk.bf16.gmra.mxu0 %vm538_vm2, %v1832_v24  ;;  %1778 = vmatmul.msk.bf16.gmra.mxu1 %vm538_vm2, %v1850_v25 }
  0x4e   :  { %1796 = vmatmul.msk.bf16.gmra.mxu2 %vm538_vm2, %v1868_v26  ;;  %1814 = vmatmul.msk.bf16.gmra.mxu3 %vm538_vm2, %v1886_v27 }
  0x5d   :  { %1761 = vmatmul.msk.bf16.gmra.mxu0 %vm538_vm2, %v1833_v28  ;;  %1779 = vmatmul.msk.bf16.gmra.mxu1 %vm538_vm2, %v1851_v29 }
  0x5e   :  { %1797 = vmatmul.msk.bf16.gmra.mxu2 %vm538_vm2, %v1869_v30  ;;  %1815 = vmatmul.msk.bf16.gmra.mxu3 %vm538_vm2, %v1887_v31 }
  0x6d   :  { %1762 = vmatmul.msk.bf16.gmra.mxu0 %vm538_vm2, %v1834_v32  ;;  %1780 = vmatmul.msk.bf16.gmra.mxu1 %vm538_vm2, %v1852_v33 }
  0x6e   :  { %1798 = vmatmul.msk.bf16.gmra.mxu2 %vm538_vm2, %v1870_v34  ;;  %1816 = vmatmul.msk.bf16.gmra.mxu3 %vm538_vm2, %v1888_v35 }
  0x7d   :  { %1763 = vmatmul.msk.bf16.gmra.mxu0 %vm538_vm2, %v1835_v36  ;;  %1781 = vmatmul.msk.bf16.gmra.mxu1 %vm538_vm2, %v1853_v37 }
  0x7e   :  { %1799 = vmatmul.msk.bf16.gmra.mxu2 %vm538_vm2, %v1871_v38  ;;  %1817 = vmatmul.msk.bf16.gmra.mxu3 %vm538_vm2, %v1889_v39  ;;  %v1838_v39 = vld [vmem:[%s2529_s0 + $0x50] sm:$0xff] }
  0x8a   :  { %v771_v43 = vpop.f32.mrf.mxu0  ;;  %v861_v44 = vpop.f32.mrf.mxu1 }
  0x8b   :  { %v772_v47 = vadd.f32 %v2072_v40, %v771_v43  ;;  %v862_v48 = vadd.f32 %v2072_v40, %v861_v44 }
  0x8d   :  { %1764 = vmatmul.msk.bf16.gmra.mxu0 %vm538_vm2, %v1836_v41  ;;  %1782 = vmatmul.msk.bf16.gmra.mxu1 %vm538_vm2, %v1854_v42  ;;  %v1131_v49 = vmax.f32 %v772_v47, 0.0  ;;  %v1167_v50 = vmax.f32 %v862_v48, 0.0  ;;  %v1856_v41 = vld [vmem:[%s2529_s0 + $0xe0] sm:$0xff]  ;;  %v1874_v48 = vld [vmem:[%s2529_s0 + $0x170] sm:$0xff] }
  0x8e   :  { %1800 = vmatmul.msk.bf16.gmra.mxu2 %vm538_vm2, %v1872_v45  ;;  %1818 = vmatmul.msk.bf16.gmra.mxu3 %vm538_vm2, %v1890_v46 }
  0x8f   :  { %v1275_v57 = vmax.f32 %v1131_v49, %v1167_v50  ;;  %v1892_v49 = vld [vmem:[%s2529_s0 + $0x200] sm:$0xff] }
  0x91   :  { %v951_v51 = vpop.f32.mrf.mxu2  ;;  %v1041_v52 = vpop.f32.mrf.mxu3 }
  0x92   :  { %v952_v53 = vadd.f32 %v2072_v40, %v951_v51  ;;  %v1042_v54 = vadd.f32 %v2072_v40, %v1041_v52  ;;  %v773_v55 = vpop.f32.mrf.mxu0  ;;  %v863_v56 = vpop.f32.mrf.mxu1 }
  0x93   :  { %v774_v60 = vadd.f32 %v2072_v40, %v773_v55  ;;  %v864_v62 = vadd.f32 %v2072_v40, %v863_v56 }
  0x94   :  { %v1203_v58 = vmax.f32 %v952_v53, 0.0  ;;  %v1239_v59 = vmax.f32 %v1042_v54, 0.0 }
  0x95   :  { %v1132_v0 = vmax.f32 %v774_v60, 0.0  ;;  %v1168_v6 = vmax.f32 %v864_v62, 0.0 }
  0x96   :  { %v1311_v61 = vmax.f32 %v1203_v58, %v1239_v59 }
  0x97   :  { %v1276_v17 = vmax.f32 %v1132_v0, %v1168_v6 }
  0x98   :  { %v1347_v63 = vmax.f32 %v1275_v57, %v1311_v61 }
  0x99   :  { %v953_v1 = vpop.f32.mrf.mxu2  ;;  %v1043_v2 = vpop.f32.mrf.mxu3 }
  0x9a   :  { %v1383_v5 = vpack.c.bf16 %v1347_v63, %v1347_v63  ;;  %v954_v7 = vadd.f32 %v2072_v40, %v953_v1  ;;  %v1044_v8 = vadd.f32 %v2072_v40, %v1043_v2  ;;  %v776_v9 = vpop.f32.mrf.mxu0  ;;  %v866_v10 = vpop.f32.mrf.mxu1 }
  0x9b   :  { %v777_v15 = vadd.f32 %v2072_v40, %v776_v9  ;;  %v867_v16 = vadd.f32 %v2072_v40, %v866_v10 }
  0x9c   :  { %1420 = vst.msk [vmem:[%s2530_s3] sm:$0xf] %vm1419_vm3, %v1383_v5  ;;  %v1204_v13 = vmax.f32 %v954_v7, 0.0  ;;  %v1240_v14 = vmax.f32 %v1044_v8, 0.0 }
  0x9d   :  { %1765 = vmatmul.msk.bf16.gmra.mxu0 %vm538_vm2, %v1837_v3  ;;  %1783 = vmatmul.msk.bf16.gmra.mxu1 %vm538_vm2, %v1855_v4  ;;  %v1133_v20 = vmax.f32 %v777_v15, 0.0  ;;  %v1169_v21 = vmax.f32 %v867_v16, 0.0 }
  0x9e   :  { %v1312_v18 = vmax.f32 %v1204_v13, %v1240_v14  ;;  %1801 = vmatmul.msk.bf16.gmra.mxu2 %vm538_vm2, %v1873_v11  ;;  %1819 = vmatmul.msk.bf16.gmra.mxu3 %vm538_vm2, %v1891_v12  ;;  %v1839_v12 = vld [vmem:[%s2529_s0 + $0x58] sm:$0xff]  ;;  %v1857_v13 = vld [vmem:[%s2529_s0 + $0xe8] sm:$0xff] }
  0x9f   :  { %v1277_v29 = vmax.f32 %v1133_v20, %v1169_v21  ;;  %v1875_v20 = vld [vmem:[%s2529_s0 + $0x178] sm:$0xff]  ;;  %v1893_v21 = vld [vmem:[%s2529_s0 + $0x208] sm:$0xff] }
  0xa0   :  { %v1348_v19 = vmax.f32 %v1276_v17, %v1312_v18 }
  0xa1   :  { %v956_v22 = vpop.f32.mrf.mxu2  ;;  %v1046_v23 = vpop.f32.mrf.mxu3 }
  0xa2   :  { %v1384_v24 = vpack.c.bf16 %v1348_v19, %v1348_v19  ;;  %v957_v25 = vadd.f32 %v2072_v40, %v956_v22  ;;  %v1047_v26 = vadd.f32 %v2072_v40, %v1046_v23  ;;  %v778_v27 = vpop.f32.mrf.mxu0  ;;  %v868_v28 = vpop.f32.mrf.mxu1 }
  0xa3   :  { %v779_v32 = vadd.f32 %v2072_v40, %v778_v27  ;;  %v869_v34 = vadd.f32 %v2072_v40, %v868_v28 }
  0xa4   :  { %1421 = vst.msk [vmem:[%s2530_s3 + $0x4] sm:$0xf] %vm1419_vm3, %v1384_v24  ;;  %v1205_v30 = vmax.f32 %v957_v25, 0.0  ;;  %v1241_v31 = vmax.f32 %v1047_v26, 0.0 }
  0xa5   :  { %v1134_v36 = vmax.f32 %v779_v32, 0.0  ;;  %v1170_v43 = vmax.f32 %v869_v34, 0.0 }
  0xa6   :  { %v1313_v33 = vmax.f32 %v1205_v30, %v1241_v31 }
  0xa7   :  { %v1278_v54 = vmax.f32 %v1134_v36, %v1170_v43 }
  0xa8   :  { %v1349_v35 = vmax.f32 %v1277_v29, %v1313_v33 }
  0xa9   :  { %v958_v37 = vpop.f32.mrf.mxu2  ;;  %v1048_v38 = vpop.f32.mrf.mxu3 }
  0xaa   :  { %v1385_v42 = vpack.c.bf16 %v1349_v35, %v1349_v35  ;;  %v959_v44 = vadd.f32 %v2072_v40, %v958_v37  ;;  %v1049_v45 = vadd.f32 %v2072_v40, %v1048_v38  ;;  %v781_v46 = vpop.f32.mrf.mxu0  ;;  %v871_v47 = vpop.f32.mrf.mxu1 }
  0xab   :  { %v782_v52 = vadd.f32 %v2072_v40, %v781_v46  ;;  %v872_v53 = vadd.f32 %v2072_v40, %v871_v47 }
  0xac   :  { %1422 = vst.msk [vmem:[%s2530_s3 + $0x8] sm:$0xf] %vm1419_vm3, %v1385_v42  ;;  %v1206_v50 = vmax.f32 %v959_v44, 0.0  ;;  %v1242_v51 = vmax.f32 %v1049_v45, 0.0 }
  0xad   :  { %1766 = vmatmul.msk.bf16.gmra.mxu0 %vm538_vm2, %v1838_v39  ;;  %1784 = vmatmul.msk.bf16.gmra.mxu1 %vm538_vm2, %v1856_v41  ;;  %v1135_v57 = vmax.f32 %v782_v52, 0.0  ;;  %v1171_v58 = vmax.f32 %v872_v53, 0.0 }
  0xae   :  { %v1314_v55 = vmax.f32 %v1206_v50, %v1242_v51  ;;  %1802 = vmatmul.msk.bf16.gmra.mxu2 %vm538_vm2, %v1874_v48  ;;  %1820 = vmatmul.msk.bf16.gmra.mxu3 %vm538_vm2, %v1892_v49  ;;  %v1840_v49 = vld [vmem:[%s2529_s0 + $0x60] sm:$0xff]  ;;  %v1858_v50 = vld [vmem:[%s2529_s0 + $0xf0] sm:$0xff] }
  0xaf   :  { %v1279_v2 = vmax.f32 %v1135_v57, %v1171_v58  ;;  %v1876_v57 = vld [vmem:[%s2529_s0 + $0x180] sm:$0xff]  ;;  %v1894_v58 = vld [vmem:[%s2529_s0 + $0x210] sm:$0xff] }
  0xb0   :  { %v1350_v56 = vmax.f32 %v1278_v54, %v1314_v55 }
  0xb1   :  { %v961_v59 = vpop.f32.mrf.mxu2  ;;  %v1051_v60 = vpop.f32.mrf.mxu3 }
  0xb2   :  { %v1386_v61 = vpack.c.bf16 %v1350_v56, %v1350_v56  ;;  %v962_v62 = vadd.f32 %v2072_v40, %v961_v59  ;;  %v1052_v63 = vadd.f32 %v2072_v40, %v1051_v60  ;;  %v783_v0 = vpop.f32.mrf.mxu0  ;;  %v873_v1 = vpop.f32.mrf.mxu1 }
  0xb3   :  { %v784_v5 = vadd.f32 %v2072_v40, %v783_v0  ;;  %v874_v7 = vadd.f32 %v2072_v40, %v873_v1 }
  0xb4   :  { %1423 = vst.msk [vmem:[%s2530_s3 + $0xc] sm:$0xf] %vm1419_vm3, %v1386_v61  ;;  %v1207_v3 = vmax.f32 %v962_v62, 0.0  ;;  %v1243_v4 = vmax.f32 %v1052_v63, 0.0 }
  0xb5   :  { %v1136_v9 = vmax.f32 %v784_v5, 0.0  ;;  %v1172_v15 = vmax.f32 %v874_v7, 0.0 }
  0xb6   :  { %v1315_v6 = vmax.f32 %v1207_v3, %v1243_v4 }
  0xb7   :  { %v1280_v26 = vmax.f32 %v1136_v9, %v1172_v15 }
  0xb8   :  { %v1351_v8 = vmax.f32 %v1279_v2, %v1315_v6 }
  0xb9   :  { %v963_v10 = vpop.f32.mrf.mxu2  ;;  %v1053_v11 = vpop.f32.mrf.mxu3 }
  0xba   :  { %v1387_v14 = vpack.c.bf16 %v1351_v8, %v1351_v8  ;;  %v964_v16 = vadd.f32 %v2072_v40, %v963_v10  ;;  %v1054_v17 = vadd.f32 %v2072_v40, %v1053_v11  ;;  %v786_v18 = vpop.f32.mrf.mxu0  ;;  %v876_v19 = vpop.f32.mrf.mxu1 }
  0xbb   :  { %v787_v24 = vadd.f32 %v2072_v40, %v786_v18  ;;  %v877_v25 = vadd.f32 %v2072_v40, %v876_v19 }
  0xbc   :  { %1424 = vst.msk [vmem:[%s2530_s3 + $0x10] sm:$0xf] %vm1419_vm3, %v1387_v14  ;;  %v1208_v22 = vmax.f32 %v964_v16, 0.0  ;;  %v1244_v23 = vmax.f32 %v1054_v17, 0.0 }
  0xbd   :  { %1767 = vmatmul.msk.bf16.gmra.mxu0 %vm538_vm2, %v1839_v12  ;;  %1785 = vmatmul.msk.bf16.gmra.mxu1 %vm538_vm2, %v1857_v13  ;;  %v1137_v29 = vmax.f32 %v787_v24, 0.0  ;;  %v1173_v30 = vmax.f32 %v877_v25, 0.0 }
  0xbe   :  { %v1316_v27 = vmax.f32 %v1208_v22, %v1244_v23  ;;  %1803 = vmatmul.msk.bf16.gmra.mxu2 %vm538_vm2, %v1875_v20  ;;  %1821 = vmatmul.msk.bf16.gmra.mxu3 %vm538_vm2, %v1893_v21  ;;  %v1841_v21 = vld [vmem:[%s2529_s0 + $0x68] sm:$0xff]  ;;  %v1859_v22 = vld [vmem:[%s2529_s0 + $0xf8] sm:$0xff] }
  0xbf   :  { %v1281_v38 = vmax.f32 %v1137_v29, %v1173_v30  ;;  %v1877_v29 = vld [vmem:[%s2529_s0 + $0x188] sm:$0xff]  ;;  %v1895_v30 = vld [vmem:[%s2529_s0 + $0x218] sm:$0xff] }
  0xc0   :  { %v1352_v28 = vmax.f32 %v1280_v26, %v1316_v27 }
  0xc1   :  { %v966_v31 = vpop.f32.mrf.mxu2  ;;  %v1056_v32 = vpop.f32.mrf.mxu3 }
  0xc2   :  { %v1388_v33 = vpack.c.bf16 %v1352_v28, %v1352_v28  ;;  %v967_v34 = vadd.f32 %v2072_v40, %v966_v31  ;;  %v1057_v35 = vadd.f32 %v2072_v40, %v1056_v32  ;;  %v788_v36 = vpop.f32.mrf.mxu0  ;;  %v878_v37 = vpop.f32.mrf.mxu1 }
  0xc3   :  { %v789_v42 = vadd.f32 %v2072_v40, %v788_v36  ;;  %v879_v44 = vadd.f32 %v2072_v40, %v878_v37 }
  0xc4   :  { %1425 = vst.msk [vmem:[%s2530_s3 + $0x14] sm:$0xf] %vm1419_vm3, %v1388_v33  ;;  %v1209_v39 = vmax.f32 %v967_v34, 0.0  ;;  %v1245_v41 = vmax.f32 %v1057_v35, 0.0 }
  0xc5   :  { %v1138_v46 = vmax.f32 %v789_v42, 0.0  ;;  %v1174_v52 = vmax.f32 %v879_v44, 0.0 }
  0xc6   :  { %v1317_v43 = vmax.f32 %v1209_v39, %v1245_v41 }
  0xc7   :  { %v1282_v63 = vmax.f32 %v1138_v46, %v1174_v52 }
  0xc8   :  { %v1353_v45 = vmax.f32 %v1281_v38, %v1317_v43 }
  0xc9   :  { %v968_v47 = vpop.f32.mrf.mxu2  ;;  %v1058_v48 = vpop.f32.mrf.mxu3 }
  0xca   :  { %v1389_v51 = vpack.c.bf16 %v1353_v45, %v1353_v45  ;;  %v969_v53 = vadd.f32 %v2072_v40, %v968_v47  ;;  %v1059_v54 = vadd.f32 %v2072_v40, %v1058_v48  ;;  %v791_v55 = vpop.f32.mrf.mxu0  ;;  %v881_v56 = vpop.f32.mrf.mxu1 }
  0xcb   :  { %v792_v61 = vadd.f32 %v2072_v40, %v791_v55  ;;  %v882_v62 = vadd.f32 %v2072_v40, %v881_v56 }
  0xcc   :  { %1426 = vst.msk [vmem:[%s2530_s3 + $0x18] sm:$0xf] %vm1419_vm3, %v1389_v51  ;;  %v1210_v59 = vmax.f32 %v969_v53, 0.0  ;;  %v1246_v60 = vmax.f32 %v1059_v54, 0.0 }
  0xcd   :  { %1768 = vmatmul.msk.bf16.gmra.mxu0 %vm538_vm2, %v1840_v49  ;;  %1786 = vmatmul.msk.bf16.gmra.mxu1 %vm538_vm2, %v1858_v50  ;;  %v1139_v2 = vmax.f32 %v792_v61, 0.0  ;;  %v1175_v3 = vmax.f32 %v882_v62, 0.0 }
  0xce   :  { %v1318_v0 = vmax.f32 %v1210_v59, %v1246_v60  ;;  %1804 = vmatmul.msk.bf16.gmra.mxu2 %vm538_vm2, %v1876_v57  ;;  %1822 = vmatmul.msk.bf16.gmra.mxu3 %vm538_vm2, %v1894_v58  ;;  %v1842_v58 = vld [vmem:[%s2529_s0 + $0x70] sm:$0xff]  ;;  %v1860_v59 = vld [vmem:[%s2529_s0 + $0x100] sm:$0xff] }
  0xcf   :  { %v1283_v11 = vmax.f32 %v1139_v2, %v1175_v3  ;;  %v1878_v2 = vld [vmem:[%s2529_s0 + $0x190] sm:$0xff]  ;;  %v1896_v3 = vld [vmem:[%s2529_s0 + $0x220] sm:$0xff] }
  0xd0   :  { %v1354_v1 = vmax.f32 %v1282_v63, %v1318_v0 }
  0xd1   :  { %v971_v4 = vpop.f32.mrf.mxu2  ;;  %v1061_v5 = vpop.f32.mrf.mxu3 }
  0xd2   :  { %v1390_v6 = vpack.c.bf16 %v1354_v1, %v1354_v1  ;;  %v972_v7 = vadd.f32 %v2072_v40, %v971_v4  ;;  %v1062_v8 = vadd.f32 %v2072_v40, %v1061_v5  ;;  %v793_v9 = vpop.f32.mrf.mxu0  ;;  %v883_v10 = vpop.f32.mrf.mxu1 }
  0xd3   :  { %v794_v14 = vadd.f32 %v2072_v40, %v793_v9  ;;  %v884_v16 = vadd.f32 %v2072_v40, %v883_v10 }
  0xd4   :  { %1427 = vst.msk [vmem:[%s2530_s3 + $0x1c] sm:$0xf] %vm1419_vm3, %v1390_v6  ;;  %v1211_v12 = vmax.f32 %v972_v7, 0.0  ;;  %v1247_v13 = vmax.f32 %v1062_v8, 0.0 }
  0xd5   :  { %v1140_v18 = vmax.f32 %v794_v14, 0.0  ;;  %v1176_v24 = vmax.f32 %v884_v16, 0.0 }
  0xd6   :  { %v1319_v15 = vmax.f32 %v1211_v12, %v1247_v13 }
  0xd7   :  { %v1284_v35 = vmax.f32 %v1140_v18, %v1176_v24 }
  0xd8   :  { %v1355_v17 = vmax.f32 %v1283_v11, %v1319_v15 }
  0xd9   :  { %v973_v19 = vpop.f32.mrf.mxu2  ;;  %v1063_v20 = vpop.f32.mrf.mxu3 }
  0xda   :  { %v1391_v23 = vpack.c.bf16 %v1355_v17, %v1355_v17  ;;  %v974_v25 = vadd.f32 %v2072_v40, %v973_v19  ;;  %v1064_v26 = vadd.f32 %v2072_v40, %v1063_v20  ;;  %v796_v27 = vpop.f32.mrf.mxu0  ;;  %v886_v28 = vpop.f32.mrf.mxu1 }
  0xdb   :  { %v797_v33 = vadd.f32 %v2072_v40, %v796_v27  ;;  %v887_v34 = vadd.f32 %v2072_v40, %v886_v28 }
  0xdc   :  { %1428 = vst.msk [vmem:[%s2530_s3 + $0x20] sm:$0xf] %vm1419_vm3, %v1391_v23  ;;  %v1212_v31 = vmax.f32 %v974_v25, 0.0  ;;  %v1248_v32 = vmax.f32 %v1064_v26, 0.0 }
  0xdd   :  { %1769 = vmatmul.msk.bf16.gmra.mxu0 %vm538_vm2, %v1841_v21  ;;  %1787 = vmatmul.msk.bf16.gmra.mxu1 %vm538_vm2, %v1859_v22  ;;  %v1141_v38 = vmax.f32 %v797_v33, 0.0  ;;  %v1177_v39 = vmax.f32 %v887_v34, 0.0 }
  0xde   :  { %v1320_v36 = vmax.f32 %v1212_v31, %v1248_v32  ;;  %1805 = vmatmul.msk.bf16.gmra.mxu2 %vm538_vm2, %v1877_v29  ;;  %1823 = vmatmul.msk.bf16.gmra.mxu3 %vm538_vm2, %v1895_v30  ;;  %v1843_v30 = vld [vmem:[%s2529_s0 + $0x78] sm:$0xff]  ;;  %v1861_v31 = vld [vmem:[%s2529_s0 + $0x108] sm:$0xff] }
  0xdf   :  { %v1285_v48 = vmax.f32 %v1141_v38, %v1177_v39  ;;  %v1879_v38 = vld [vmem:[%s2529_s0 + $0x198] sm:$0xff]  ;;  %v1897_v39 = vld [vmem:[%s2529_s0 + $0x228] sm:$0xff] }
  0xe0   :  { %v1356_v37 = vmax.f32 %v1284_v35, %v1320_v36 }
  0xe1   :  { %v976_v41 = vpop.f32.mrf.mxu2  ;;  %v1066_v42 = vpop.f32.mrf.mxu3 }
  0xe2   :  { %v1392_v43 = vpack.c.bf16 %v1356_v37, %v1356_v37  ;;  %v977_v44 = vadd.f32 %v2072_v40, %v976_v41  ;;  %v1067_v45 = vadd.f32 %v2072_v40, %v1066_v42  ;;  %v798_v46 = vpop.f32.mrf.mxu0  ;;  %v888_v47 = vpop.f32.mrf.mxu1 }
  0xe3   :  { %v799_v51 = vadd.f32 %v2072_v40, %v798_v46  ;;  %v889_v53 = vadd.f32 %v2072_v40, %v888_v47 }
  0xe4   :  { %1429 = vst.msk [vmem:[%s2530_s3 + $0x24] sm:$0xf] %vm1419_vm3, %v1392_v43  ;;  %v1213_v49 = vmax.f32 %v977_v44, 0.0  ;;  %v1249_v50 = vmax.f32 %v1067_v45, 0.0 }
  0xe5   :  { %v1142_v55 = vmax.f32 %v799_v51, 0.0  ;;  %v1178_v61 = vmax.f32 %v889_v53, 0.0 }
  0xe6   :  { %v1321_v52 = vmax.f32 %v1213_v49, %v1249_v50 }
  0xe7   :  { %v1286_v8 = vmax.f32 %v1142_v55, %v1178_v61 }
  0xe8   :  { %v1357_v54 = vmax.f32 %v1285_v48, %v1321_v52 }
  0xe9   :  { %v978_v56 = vpop.f32.mrf.mxu2  ;;  %v1068_v57 = vpop.f32.mrf.mxu3 }
  0xea   :  { %v1393_v60 = vpack.c.bf16 %v1357_v54, %v1357_v54  ;;  %v979_v62 = vadd.f32 %v2072_v40, %v978_v56  ;;  %v1069_v63 = vadd.f32 %v2072_v40, %v1068_v57  ;;  %v801_v0 = vpop.f32.mrf.mxu0  ;;  %v891_v1 = vpop.f32.mrf.mxu1 }
  0xeb   :  { %v802_v6 = vadd.f32 %v2072_v40, %v801_v0  ;;  %v892_v7 = vadd.f32 %v2072_v40, %v891_v1 }
  0xec   :  { %1430 = vst.msk [vmem:[%s2530_s3 + $0x28] sm:$0xf] %vm1419_vm3, %v1393_v60  ;;  %v1214_v4 = vmax.f32 %v979_v62, 0.0  ;;  %v1250_v5 = vmax.f32 %v1069_v63, 0.0 }
  0xed   :  { %1770 = vmatmul.msk.bf16.gmra.mxu0 %vm538_vm2, %v1842_v58  ;;  %1788 = vmatmul.msk.bf16.gmra.mxu1 %vm538_vm2, %v1860_v59  ;;  %v1143_v11 = vmax.f32 %v802_v6, 0.0  ;;  %v1179_v12 = vmax.f32 %v892_v7, 0.0 }
  0xee   :  { %v1322_v9 = vmax.f32 %v1214_v4, %v1250_v5  ;;  %1806 = vmatmul.msk.bf16.gmra.mxu2 %vm538_vm2, %v1878_v2  ;;  %1824 = vmatmul.msk.bf16.gmra.mxu3 %vm538_vm2, %v1896_v3  ;;  %v1844_v3 = vld [vmem:[%s2529_s0 + $0x80] sm:$0xff]  ;;  %v1862_v4 = vld [vmem:[%s2529_s0 + $0x110] sm:$0xff] }
  0xef   :  { %v1287_v20 = vmax.f32 %v1143_v11, %v1179_v12  ;;  %v1880_v11 = vld [vmem:[%s2529_s0 + $0x1a0] sm:$0xff]  ;;  %v1898_v12 = vld [vmem:[%s2529_s0 + $0x230] sm:$0xff] }
  0xf0   :  { %v1358_v10 = vmax.f32 %v1286_v8, %v1322_v9 }
  0xf1   :  { %v981_v13 = vpop.f32.mrf.mxu2  ;;  %v1071_v14 = vpop.f32.mrf.mxu3 }
  0xf2   :  { %v1394_v15 = vpack.c.bf16 %v1358_v10, %v1358_v10  ;;  %v982_v16 = vadd.f32 %v2072_v40, %v981_v13  ;;  %v1072_v17 = vadd.f32 %v2072_v40, %v1071_v14  ;;  %v803_v18 = vpop.f32.mrf.mxu0  ;;  %v893_v19 = vpop.f32.mrf.mxu1 }
  0xf3   :  { %v804_v23 = vadd.f32 %v2072_v40, %v803_v18  ;;  %v894_v25 = vadd.f32 %v2072_v40, %v893_v19 }
  0xf4   :  { %1431 = vst.msk [vmem:[%s2530_s3 + $0x2c] sm:$0xf] %vm1419_vm3, %v1394_v15  ;;  %v1215_v21 = vmax.f32 %v982_v16, 0.0  ;;  %v1251_v22 = vmax.f32 %v1072_v17, 0.0 }
  0xf5   :  { %v1144_v27 = vmax.f32 %v804_v23, 0.0  ;;  %v1180_v33 = vmax.f32 %v894_v25, 0.0 }
  0xf6   :  { %v1323_v24 = vmax.f32 %v1215_v21, %v1251_v22 }
  0xf7   :  { %v1288_v45 = vmax.f32 %v1144_v27, %v1180_v33 }
  0xf8   :  { %v1359_v26 = vmax.f32 %v1287_v20, %v1323_v24 }
  0xf9   :  { %v983_v28 = vpop.f32.mrf.mxu2  ;;  %v1073_v29 = vpop.f32.mrf.mxu3 }
  0xfa   :  { %v1395_v32 = vpack.c.bf16 %v1359_v26, %v1359_v26  ;;  %v984_v34 = vadd.f32 %v2072_v40, %v983_v28  ;;  %v1074_v35 = vadd.f32 %v2072_v40, %v1073_v29  ;;  %v806_v36 = vpop.f32.mrf.mxu0  ;;  %v896_v37 = vpop.f32.mrf.mxu1 }
  0xfb   :  { %v807_v43 = vadd.f32 %v2072_v40, %v806_v36  ;;  %v897_v44 = vadd.f32 %v2072_v40, %v896_v37 }
  0xfc   :  { %1432 = vst.msk [vmem:[%s2530_s3 + $0x30] sm:$0xf] %vm1419_vm3, %v1395_v32  ;;  %v1216_v41 = vmax.f32 %v984_v34, 0.0  ;;  %v1252_v42 = vmax.f32 %v1074_v35, 0.0 }
  0xfd   :  { %1771 = vmatmul.msk.bf16.gmra.mxu0 %vm538_vm2, %v1843_v30  ;;  %1789 = vmatmul.msk.bf16.gmra.mxu1 %vm538_vm2, %v1861_v31  ;;  %v1145_v48 = vmax.f32 %v807_v43, 0.0  ;;  %v1181_v49 = vmax.f32 %v897_v44, 0.0 }
  0xfe   :  { %v1324_v46 = vmax.f32 %v1216_v41, %v1252_v42  ;;  %1807 = vmatmul.msk.bf16.gmra.mxu2 %vm538_vm2, %v1879_v38  ;;  %1825 = vmatmul.msk.bf16.gmra.mxu3 %vm538_vm2, %v1897_v39  ;;  %v1845_v39 = vld [vmem:[%s2529_s0 + $0x88] sm:$0xff]  ;;  %v1863_v41 = vld [vmem:[%s2529_s0 + $0x118] sm:$0xff] }
  0xff   :  { %v1289_v57 = vmax.f32 %v1145_v48, %v1181_v49  ;;  %v1881_v48 = vld [vmem:[%s2529_s0 + $0x1a8] sm:$0xff]  ;;  %v1899_v49 = vld [vmem:[%s2529_s0 + $0x238] sm:$0xff] }
 0x100   :  { %v1360_v47 = vmax.f32 %v1288_v45, %v1324_v46 }
 0x101   :  { %v986_v50 = vpop.f32.mrf.mxu2  ;;  %v1076_v51 = vpop.f32.mrf.mxu3 }
 0x102   :  { %v1396_v52 = vpack.c.bf16 %v1360_v47, %v1360_v47  ;;  %v987_v53 = vadd.f32 %v2072_v40, %v986_v50  ;;  %v1077_v54 = vadd.f32 %v2072_v40, %v1076_v51  ;;  %v808_v55 = vpop.f32.mrf.mxu0  ;;  %v898_v56 = vpop.f32.mrf.mxu1 }
 0x103   :  { %v809_v60 = vadd.f32 %v2072_v40, %v808_v55  ;;  %v899_v62 = vadd.f32 %v2072_v40, %v898_v56 }
 0x104   :  { %1433 = vst.msk [vmem:[%s2530_s3 + $0x34] sm:$0xf] %vm1419_vm3, %v1396_v52  ;;  %v1217_v58 = vmax.f32 %v987_v53, 0.0  ;;  %v1253_v59 = vmax.f32 %v1077_v54, 0.0 }
 0x105   :  { %v1146_v0 = vmax.f32 %v809_v60, 0.0  ;;  %v1182_v6 = vmax.f32 %v899_v62, 0.0 }
 0x106   :  { %v1325_v61 = vmax.f32 %v1217_v58, %v1253_v59 }
 0x107   :  { %v1290_v17 = vmax.f32 %v1146_v0, %v1182_v6 }
 0x108   :  { %v1361_v63 = vmax.f32 %v1289_v57, %v1325_v61 }
 0x109   :  { %v988_v1 = vpop.f32.mrf.mxu2  ;;  %v1078_v2 = vpop.f32.mrf.mxu3 }
 0x10a   :  { %v1397_v5 = vpack.c.bf16 %v1361_v63, %v1361_v63  ;;  %v989_v7 = vadd.f32 %v2072_v40, %v988_v1  ;;  %v1079_v8 = vadd.f32 %v2072_v40, %v1078_v2  ;;  %v811_v9 = vpop.f32.mrf.mxu0  ;;  %v901_v10 = vpop.f32.mrf.mxu1 }
 0x10b   :  { %v812_v15 = vadd.f32 %v2072_v40, %v811_v9  ;;  %v902_v16 = vadd.f32 %v2072_v40, %v901_v10 }
 0x10c   :  { %1434 = vst.msk [vmem:[%s2530_s3 + $0x38] sm:$0xf] %vm1419_vm3, %v1397_v5  ;;  %v1218_v13 = vmax.f32 %v989_v7, 0.0  ;;  %v1254_v14 = vmax.f32 %v1079_v8, 0.0 }
 0x10d   :  { %1772 = vmatmul.msk.bf16.gmra.mxu0 %vm538_vm2, %v1844_v3  ;;  %1790 = vmatmul.msk.bf16.gmra.mxu1 %vm538_vm2, %v1862_v4  ;;  %v1147_v20 = vmax.f32 %v812_v15, 0.0  ;;  %v1183_v21 = vmax.f32 %v902_v16, 0.0 }
 0x10e   :  { %v1326_v18 = vmax.f32 %v1218_v13, %v1254_v14  ;;  %1808 = vmatmul.msk.bf16.gmra.mxu2 %vm538_vm2, %v1880_v11  ;;  %1826 = vmatmul.msk.bf16.gmra.mxu3 %vm538_vm2, %v1898_v12 }
 0x10f   :  { %v1291_v29 = vmax.f32 %v1147_v20, %v1183_v21 }
 0x110   :  { %v1362_v19 = vmax.f32 %v1290_v17, %v1326_v18 }
 0x111   :  { %v991_v22 = vpop.f32.mrf.mxu2  ;;  %v1081_v23 = vpop.f32.mrf.mxu3 }
 0x112   :  { %v1398_v24 = vpack.c.bf16 %v1362_v19, %v1362_v19  ;;  %v992_v25 = vadd.f32 %v2072_v40, %v991_v22  ;;  %v1082_v26 = vadd.f32 %v2072_v40, %v1081_v23  ;;  %v813_v27 = vpop.f32.mrf.mxu0  ;;  %v903_v28 = vpop.f32.mrf.mxu1 }
 0x113   :  { %v814_v32 = vadd.f32 %v2072_v40, %v813_v27  ;;  %v904_v34 = vadd.f32 %v2072_v40, %v903_v28 }
 0x114   :  { %1435 = vst.msk [vmem:[%s2530_s3 + $0x3c] sm:$0xf] %vm1419_vm3, %v1398_v24  ;;  %v1219_v30 = vmax.f32 %v992_v25, 0.0  ;;  %v1255_v31 = vmax.f32 %v1082_v26, 0.0 }
 0x115   :  { %v1148_v36 = vmax.f32 %v814_v32, 0.0  ;;  %v1184_v43 = vmax.f32 %v904_v34, 0.0 }
 0x116   :  { %v1327_v33 = vmax.f32 %v1219_v30, %v1255_v31 }
 0x117   :  { %v1292_v54 = vmax.f32 %v1148_v36, %v1184_v43 }
 0x118   :  { %v1363_v35 = vmax.f32 %v1291_v29, %v1327_v33 }
 0x119   :  { %v993_v37 = vpop.f32.mrf.mxu2  ;;  %v1083_v38 = vpop.f32.mrf.mxu3 }
 0x11a   :  { %v1399_v42 = vpack.c.bf16 %v1363_v35, %v1363_v35  ;;  %v994_v44 = vadd.f32 %v2072_v40, %v993_v37  ;;  %v1084_v45 = vadd.f32 %v2072_v40, %v1083_v38  ;;  %v816_v46 = vpop.f32.mrf.mxu0  ;;  %v906_v47 = vpop.f32.mrf.mxu1 }
 0x11b   :  { %v817_v52 = vadd.f32 %v2072_v40, %v816_v46  ;;  %v907_v53 = vadd.f32 %v2072_v40, %v906_v47 }
 0x11c   :  { %1436 = vst.msk [vmem:[%s2530_s3 + $0x40] sm:$0xf] %vm1419_vm3, %v1399_v42  ;;  %v1220_v50 = vmax.f32 %v994_v44, 0.0  ;;  %v1256_v51 = vmax.f32 %v1084_v45, 0.0 }
 0x11d   :  { %1773 = vmatmul.msk.bf16.gmra.mxu0 %vm538_vm2, %v1845_v39  ;;  %1791 = vmatmul.msk.bf16.gmra.mxu1 %vm538_vm2, %v1863_v41  ;;  %v1149_v57 = vmax.f32 %v817_v52, 0.0  ;;  %v1185_v58 = vmax.f32 %v907_v53, 0.0 }
 0x11e   :  { %v1328_v55 = vmax.f32 %v1220_v50, %v1256_v51  ;;  %1809 = vmatmul.msk.bf16.gmra.mxu2 %vm538_vm2, %v1881_v48  ;;  %1827 = vmatmul.msk.bf16.gmra.mxu3 %vm538_vm2, %v1899_v49 }
 0x11f   :  { %v1293_v2 = vmax.f32 %v1149_v57, %v1185_v58 }
 0x120   :  { %v1364_v56 = vmax.f32 %v1292_v54, %v1328_v55 }
 0x121   :  { %v996_v59 = vpop.f32.mrf.mxu2  ;;  %v1086_v60 = vpop.f32.mrf.mxu3 }
 0x122   :  { %v1400_v61 = vpack.c.bf16 %v1364_v56, %v1364_v56  ;;  %v997_v62 = vadd.f32 %v2072_v40, %v996_v59  ;;  %v1087_v63 = vadd.f32 %v2072_v40, %v1086_v60  ;;  %v818_v0 = vpop.f32.mrf.mxu0  ;;  %v908_v1 = vpop.f32.mrf.mxu1 }
 0x123   :  { %v819_v5 = vadd.f32 %v2072_v40, %v818_v0  ;;  %v909_v7 = vadd.f32 %v2072_v40, %v908_v1 }
 0x124   :  { %1437 = vst.msk [vmem:[%s2530_s3 + $0x44] sm:$0xf] %vm1419_vm3, %v1400_v61  ;;  %v1221_v3 = vmax.f32 %v997_v62, 0.0  ;;  %v1257_v4 = vmax.f32 %v1087_v63, 0.0 }
 0x125   :  { %v1150_v9 = vmax.f32 %v819_v5, 0.0  ;;  %v1186_v13 = vmax.f32 %v909_v7, 0.0 }
 0x126   :  { %v1329_v6 = vmax.f32 %v1221_v3, %v1257_v4 }
 0x127   :  { %v1294_v22 = vmax.f32 %v1150_v9, %v1186_v13 }
 0x128   :  { %v1365_v8 = vmax.f32 %v1293_v2, %v1329_v6 }
 0x129   :  { %v998_v10 = vpop.f32.mrf.mxu2  ;;  %v1088_v11 = vpop.f32.mrf.mxu3 }
 0x12a   :  { %v1401_v12 = vpack.c.bf16 %v1365_v8, %v1365_v8  ;;  %v999_v14 = vadd.f32 %v2072_v40, %v998_v10  ;;  %v1089_v15 = vadd.f32 %v2072_v40, %v1088_v11  ;;  %v821_v16 = vpop.f32.mrf.mxu0  ;;  %v911_v17 = vpop.f32.mrf.mxu1 }
 0x12b   :  { %v822_v20 = vadd.f32 %v2072_v40, %v821_v16  ;;  %v912_v21 = vadd.f32 %v2072_v40, %v911_v17 }
 0x12c   :  { %1438 = vst.msk [vmem:[%s2530_s3 + $0x48] sm:$0xf] %vm1419_vm3, %v1401_v12  ;;  %v1222_v18 = vmax.f32 %v999_v14, 0.0  ;;  %v1258_v19 = vmax.f32 %v1089_v15, 0.0 }
 0x12d   :  { %v1151_v25 = vmax.f32 %v822_v20, 0.0  ;;  %v1187_v26 = vmax.f32 %v912_v21, 0.0 }
 0x12e   :  { %v1330_v23 = vmax.f32 %v1222_v18, %v1258_v19 }
 0x12f   :  { %v1295_v34 = vmax.f32 %v1151_v25, %v1187_v26 }
 0x130   :  { %v1366_v24 = vmax.f32 %v1294_v22, %v1330_v23 }
 0x131   :  { %v1001_v27 = vpop.f32.mrf.mxu2  ;;  %v1091_v28 = vpop.f32.mrf.mxu3 }
 0x132   :  { %v1402_v29 = vpack.c.bf16 %v1366_v24, %v1366_v24  ;;  %v1002_v30 = vadd.f32 %v2072_v40, %v1001_v27  ;;  %v1092_v31 = vadd.f32 %v2072_v40, %v1091_v28  ;;  %v823_v32 = vpop.f32.mrf.mxu0  ;;  %v913_v33 = vpop.f32.mrf.mxu1 }
 0x133   :  { %v824_v37 = vadd.f32 %v2072_v40, %v823_v32  ;;  %v914_v39 = vadd.f32 %v2072_v40, %v913_v33 }
 0x134   :  { %1439 = vst.msk [vmem:[%s2530_s3 + $0x4c] sm:$0xf] %vm1419_vm3, %v1402_v29  ;;  %v1223_v35 = vmax.f32 %v1002_v30, 0.0  ;;  %v1259_v36 = vmax.f32 %v1092_v31, 0.0 }
 0x135   :  { %v1152_v42 = vmax.f32 %v824_v37, 0.0  ;;  %v1188_v46 = vmax.f32 %v914_v39, 0.0 }
 0x136   :  { %v1331_v38 = vmax.f32 %v1223_v35, %v1259_v36 }
 0x137   :  { %v1296_v55 = vmax.f32 %v1152_v42, %v1188_v46 }
 0x138   :  { %v1367_v41 = vmax.f32 %v1295_v34, %v1331_v38 }
 0x139   :  { %v1003_v43 = vpop.f32.mrf.mxu2  ;;  %v1093_v44 = vpop.f32.mrf.mxu3 }
 0x13a   :  { %v1403_v45 = vpack.c.bf16 %v1367_v41, %v1367_v41  ;;  %v1004_v47 = vadd.f32 %v2072_v40, %v1003_v43  ;;  %v1094_v48 = vadd.f32 %v2072_v40, %v1093_v44  ;;  %v826_v49 = vpop.f32.mrf.mxu0  ;;  %v916_v50 = vpop.f32.mrf.mxu1 }
 0x13b   :  { %v827_v53 = vadd.f32 %v2072_v40, %v826_v49  ;;  %v917_v54 = vadd.f32 %v2072_v40, %v916_v50 }
 0x13c   :  { %1440 = vst.msk [vmem:[%s2530_s3 + $0x50] sm:$0xf] %vm1419_vm3, %v1403_v45  ;;  %v1224_v51 = vmax.f32 %v1004_v47, 0.0  ;;  %v1260_v52 = vmax.f32 %v1094_v48, 0.0  ;;  %v2435_v48 = vld [vmem:[%s2528_s2] ss:$0 sm:$0xff] }
 0x13d   :  { %v1153_v58 = vmax.f32 %v827_v53, 0.0  ;;  %v1189_v59 = vmax.f32 %v917_v54, 0.0 }
 0x13e   :  { %v1332_v56 = vmax.f32 %v1224_v51, %v1260_v52 }
 0x13f   :  { %v1297_v3 = vmax.f32 %v1153_v58, %v1189_v59 }
 0x140   :  { %v1368_v57 = vmax.f32 %v1296_v55, %v1332_v56 }
 0x141   :  { %v1006_v60 = vpop.f32.mrf.mxu2  ;;  %v1096_v61 = vpop.f32.mrf.mxu3 }
 0x142   :  { %v1404_v62 = vpack.c.bf16 %v1368_v57, %v1368_v57  ;;  %v1007_v63 = vadd.f32 %v2072_v40, %v1006_v60  ;;  %v1097_v0 = vadd.f32 %v2072_v40, %v1096_v61  ;;  %v828_v1 = vpop.f32.mrf.mxu0  ;;  %v918_v2 = vpop.f32.mrf.mxu1 }
 0x143   :  { %v829_v6 = vadd.f32 %v2072_v40, %v828_v1  ;;  %v919_v8 = vadd.f32 %v2072_v40, %v918_v2 }
 0x144   :  { %1441 = vst.msk [vmem:[%s2530_s3 + $0x54] sm:$0xf] %vm1419_vm3, %v1404_v62  ;;  %v1225_v4 = vmax.f32 %v1007_v63, 0.0  ;;  %v1261_v5 = vmax.f32 %v1097_v0, 0.0 }
 0x145   :  { %v1154_v10 = vmax.f32 %v829_v6, 0.0  ;;  %v1190_v14 = vmax.f32 %v919_v8, 0.0 }
 0x146   :  { %v1333_v7 = vmax.f32 %v1225_v4, %v1261_v5 }
 0x147   :  { %v1298_v23 = vmax.f32 %v1154_v10, %v1190_v14 }
 0x148   :  { %v1369_v9 = vmax.f32 %v1297_v3, %v1333_v7 }
 0x149   :  { %v1008_v11 = vpop.f32.mrf.mxu2  ;;  %v1098_v12 = vpop.f32.mrf.mxu3 }
 0x14a   :  { %v1405_v13 = vpack.c.bf16 %v1369_v9, %v1369_v9  ;;  %v1009_v15 = vadd.f32 %v2072_v40, %v1008_v11  ;;  %v1099_v16 = vadd.f32 %v2072_v40, %v1098_v12  ;;  %v831_v17 = vpop.f32.mrf.mxu0  ;;  %v921_v18 = vpop.f32.mrf.mxu1 }
 0x14b   :  { %v832_v21 = vadd.f32 %v2072_v40, %v831_v17  ;;  %v922_v22 = vadd.f32 %v2072_v40, %v921_v18 }
 0x14c   :  { %1442 = vst.msk [vmem:[%s2530_s3 + $0x58] sm:$0xf] %vm1419_vm3, %v1405_v13  ;;  %v1226_v19 = vmax.f32 %v1009_v15, 0.0  ;;  %v1262_v20 = vmax.f32 %v1099_v16, 0.0 }
 0x14d   :  { %v1155_v26 = vmax.f32 %v832_v21, 0.0  ;;  %v1191_v27 = vmax.f32 %v922_v22, 0.0 }
 0x14e   :  { %v1334_v24 = vmax.f32 %v1226_v19, %v1262_v20 }
 0x14f   :  { %v1299_v35 = vmax.f32 %v1155_v26, %v1191_v27 }
 0x150   :  { %v1370_v25 = vmax.f32 %v1298_v23, %v1334_v24 }
 0x151   :  { %v1011_v28 = vpop.f32.mrf.mxu2  ;;  %v1101_v29 = vpop.f32.mrf.mxu3 }
 0x152   :  { %v1406_v30 = vpack.c.bf16 %v1370_v25, %v1370_v25  ;;  %v1012_v31 = vadd.f32 %v2072_v40, %v1011_v28  ;;  %v1102_v32 = vadd.f32 %v2072_v40, %v1101_v29  ;;  %v833_v33 = vpop.f32.mrf.mxu0  ;;  %v923_v34 = vpop.f32.mrf.mxu1 }
 0x153   :  { %v834_v38 = vadd.f32 %v2072_v40, %v833_v33  ;;  %v924_v41 = vadd.f32 %v2072_v40, %v923_v34 }
 0x154   :  { %1443 = vst.msk [vmem:[%s2530_s3 + $0x5c] sm:$0xf] %vm1419_vm3, %v1406_v30  ;;  %v1227_v36 = vmax.f32 %v1012_v31, 0.0  ;;  %v1263_v37 = vmax.f32 %v1102_v32, 0.0 }
 0x155   :  { %v1156_v43 = vmax.f32 %v834_v38, 0.0  ;;  %v1192_v47 = vmax.f32 %v924_v41, 0.0 }
 0x156   :  { %v1335_v39 = vmax.f32 %v1227_v36, %v1263_v37 }
 0x157   :  { %v1300_v56 = vmax.f32 %v1156_v43, %v1192_v47 }
 0x158   :  { %v1371_v42 = vmax.f32 %v1299_v35, %v1335_v39 }
 0x159   :  { %v1013_v44 = vpop.f32.mrf.mxu2  ;;  %v1103_v45 = vpop.f32.mrf.mxu3 }
 0x15a   :  { %v1407_v46 = vpack.c.bf16 %v1371_v42, %v1371_v42  ;;  %v1014_v49 = vadd.f32 %v2435_v48, %v1013_v44  ;;  %v1104_v50 = vadd.f32 %v2435_v48, %v1103_v45  ;;  %v836_v51 = vpop.f32.mrf.mxu0  ;;  %v926_v52 = vpop.f32.mrf.mxu1 }
 0x15b   :  { %v837_v54 = vadd.f32 %v2435_v48, %v836_v51  ;;  %v927_v55 = vadd.f32 %v2435_v48, %v926_v52 }
 0x15c   :  { %1444 = vst.msk [vmem:[%s2530_s3 + $0x60] sm:$0xf] %vm1419_vm3, %v1407_v46  ;;  %v1228_v40 = vmax.f32 %v1014_v49, 0.0  ;;  %v1264_v53 = vmax.f32 %v1104_v50, 0.0 }
 0x15d   :  { %v1157_v59 = vmax.f32 %v837_v54, 0.0  ;;  %v1193_v60 = vmax.f32 %v927_v55, 0.0 }
 0x15e   :  { %v1336_v57 = vmax.f32 %v1228_v40, %v1264_v53 }
 0x15f   :  { %v1301_v4 = vmax.f32 %v1157_v59, %v1193_v60 }
 0x160   :  { %v1372_v58 = vmax.f32 %v1300_v56, %v1336_v57 }
 0x161   :  { %v1016_v61 = vpop.f32.mrf.mxu2  ;;  %v1106_v62 = vpop.f32.mrf.mxu3 }
 0x162   :  { %v1408_v63 = vpack.c.bf16 %v1372_v58, %v1372_v58  ;;  %v1017_v0 = vadd.f32 %v2435_v48, %v1016_v61  ;;  %v1107_v1 = vadd.f32 %v2435_v48, %v1106_v62  ;;  %v838_v2 = vpop.f32.mrf.mxu0  ;;  %v928_v3 = vpop.f32.mrf.mxu1 }
 0x163   :  { %v839_v7 = vadd.f32 %v2435_v48, %v838_v2  ;;  %v929_v9 = vadd.f32 %v2435_v48, %v928_v3 }
 0x164   :  { %1445 = vst.msk [vmem:[%s2530_s3 + $0x64] sm:$0xf] %vm1419_vm3, %v1408_v63  ;;  %v1229_v5 = vmax.f32 %v1017_v0, 0.0  ;;  %v1265_v6 = vmax.f32 %v1107_v1, 0.0 }
 0x165   :  { %v1158_v11 = vmax.f32 %v839_v7, 0.0  ;;  %v1194_v15 = vmax.f32 %v929_v9, 0.0 }
 0x166   :  { %v1337_v8 = vmax.f32 %v1229_v5, %v1265_v6 }
 0x167   :  { %v1302_v24 = vmax.f32 %v1158_v11, %v1194_v15 }
 0x168   :  { %v1373_v10 = vmax.f32 %v1301_v4, %v1337_v8 }
 0x169   :  { %v1018_v12 = vpop.f32.mrf.mxu2  ;;  %v1108_v13 = vpop.f32.mrf.mxu3 }
 0x16a   :  { %v1409_v14 = vpack.c.bf16 %v1373_v10, %v1373_v10  ;;  %v1019_v16 = vadd.f32 %v2435_v48, %v1018_v12  ;;  %v1109_v17 = vadd.f32 %v2435_v48, %v1108_v13  ;;  %v841_v18 = vpop.f32.mrf.mxu0  ;;  %v931_v19 = vpop.f32.mrf.mxu1 }
 0x16b   :  { %v842_v22 = vadd.f32 %v2435_v48, %v841_v18  ;;  %v932_v23 = vadd.f32 %v2435_v48, %v931_v19 }
 0x16c   :  { %1446 = vst.msk [vmem:[%s2530_s3 + $0x68] sm:$0xf] %vm1419_vm3, %v1409_v14  ;;  %v1230_v20 = vmax.f32 %v1019_v16, 0.0  ;;  %v1266_v21 = vmax.f32 %v1109_v17, 0.0 }
 0x16d   :  { %v1159_v27 = vmax.f32 %v842_v22, 0.0  ;;  %v1195_v28 = vmax.f32 %v932_v23, 0.0 }
 0x16e   :  { %v1338_v25 = vmax.f32 %v1230_v20, %v1266_v21 }
 0x16f   :  { %v1303_v36 = vmax.f32 %v1159_v27, %v1195_v28 }
 0x170   :  { %v1374_v26 = vmax.f32 %v1302_v24, %v1338_v25 }
 0x171   :  { %v1021_v29 = vpop.f32.mrf.mxu2  ;;  %v1111_v30 = vpop.f32.mrf.mxu3 }
 0x172   :  { %v1410_v31 = vpack.c.bf16 %v1374_v26, %v1374_v26  ;;  %v1022_v32 = vadd.f32 %v2435_v48, %v1021_v29  ;;  %v1112_v33 = vadd.f32 %v2435_v48, %v1111_v30  ;;  %v843_v34 = vpop.f32.mrf.mxu0  ;;  %v933_v35 = vpop.f32.mrf.mxu1 }
 0x173   :  { %v844_v39 = vadd.f32 %v2435_v48, %v843_v34  ;;  %v934_v42 = vadd.f32 %v2435_v48, %v933_v35 }
 0x174   :  { %1447 = vst.msk [vmem:[%s2530_s3 + $0x6c] sm:$0xf] %vm1419_vm3, %v1410_v31  ;;  %v1231_v37 = vmax.f32 %v1022_v32, 0.0  ;;  %v1267_v38 = vmax.f32 %v1112_v33, 0.0 }
 0x175   :  { %v1160_v44 = vmax.f32 %v844_v39, 0.0  ;;  %v1196_v49 = vmax.f32 %v934_v42, 0.0 }
 0x176   :  { %v1339_v41 = vmax.f32 %v1231_v37, %v1267_v38 }
 0x177   :  { %v1304_v57 = vmax.f32 %v1160_v44, %v1196_v49 }
 0x178   :  { %v1375_v43 = vmax.f32 %v1303_v36, %v1339_v41 }
 0x179   :  { %v1023_v45 = vpop.f32.mrf.mxu2  ;;  %v1113_v46 = vpop.f32.mrf.mxu3 }
 0x17a   :  { %v1411_v47 = vpack.c.bf16 %v1375_v43, %v1375_v43  ;;  %v1024_v50 = vadd.f32 %v2435_v48, %v1023_v45  ;;  %v1114_v51 = vadd.f32 %v2435_v48, %v1113_v46  ;;  %v846_v52 = vpop.f32.mrf.mxu0  ;;  %v936_v40 = vpop.f32.mrf.mxu1 }
 0x17b   :  { %v847_v55 = vadd.f32 %v2435_v48, %v846_v52  ;;  %v937_v56 = vadd.f32 %v2435_v48, %v936_v40 }
 0x17c   :  { %1448 = vst.msk [vmem:[%s2530_s3 + $0x70] sm:$0xf] %vm1419_vm3, %v1411_v47  ;;  %v1232_v53 = vmax.f32 %v1024_v50, 0.0  ;;  %v1268_v54 = vmax.f32 %v1114_v51, 0.0 }
 0x17d   :  { %v1161_v60 = vmax.f32 %v847_v55, 0.0  ;;  %v1197_v61 = vmax.f32 %v937_v56, 0.0 }
 0x17e   :  { %v1340_v58 = vmax.f32 %v1232_v53, %v1268_v54 }
 0x17f   :  { %v1305_v5 = vmax.f32 %v1161_v60, %v1197_v61 }
 0x180   :  { %v1376_v59 = vmax.f32 %v1304_v57, %v1340_v58 }
 0x181   :  { %v1026_v62 = vpop.f32.mrf.mxu2  ;;  %v1116_v63 = vpop.f32.mrf.mxu3 }
 0x182   :  { %v1412_v0 = vpack.c.bf16 %v1376_v59, %v1376_v59  ;;  %v1027_v1 = vadd.f32 %v2435_v48, %v1026_v62  ;;  %v1117_v2 = vadd.f32 %v2435_v48, %v1116_v63  ;;  %v848_v3 = vpop.f32.mrf.mxu0  ;;  %v938_v4 = vpop.f32.mrf.mxu1 }
 0x183   :  { %v849_v8 = vadd.f32 %v2435_v48, %v848_v3  ;;  %v939_v10 = vadd.f32 %v2435_v48, %v938_v4 }
 0x184   :  { %1449 = vst.msk [vmem:[%s2530_s3 + $0x74] sm:$0xf] %vm1419_vm3, %v1412_v0  ;;  %v1233_v6 = vmax.f32 %v1027_v1, 0.0  ;;  %v1269_v7 = vmax.f32 %v1117_v2, 0.0 }
 0x185   :  { %v1162_v12 = vmax.f32 %v849_v8, 0.0  ;;  %v1198_v16 = vmax.f32 %v939_v10, 0.0 }
 0x186   :  { %v1341_v9 = vmax.f32 %v1233_v6, %v1269_v7 }
 0x187   :  { %v1306_v25 = vmax.f32 %v1162_v12, %v1198_v16 }
 0x188   :  { %v1377_v11 = vmax.f32 %v1305_v5, %v1341_v9 }
 0x189   :  { %v1028_v13 = vpop.f32.mrf.mxu2  ;;  %v1118_v14 = vpop.f32.mrf.mxu3 }
 0x18a   :  { %v1413_v15 = vpack.c.bf16 %v1377_v11, %v1377_v11  ;;  %v1029_v17 = vadd.f32 %v2435_v48, %v1028_v13  ;;  %v1119_v18 = vadd.f32 %v2435_v48, %v1118_v14  ;;  %v851_v19 = vpop.f32.mrf.mxu0  ;;  %v941_v20 = vpop.f32.mrf.mxu1 }
 0x18b   :  { %v852_v23 = vadd.f32 %v2435_v48, %v851_v19  ;;  %v942_v24 = vadd.f32 %v2435_v48, %v941_v20 }
 0x18c   :  { %1450 = vst.msk [vmem:[%s2530_s3 + $0x78] sm:$0xf] %vm1419_vm3, %v1413_v15  ;;  %v1234_v21 = vmax.f32 %v1029_v17, 0.0  ;;  %v1270_v22 = vmax.f32 %v1119_v18, 0.0 }
 0x18d   :  { %v1163_v28 = vmax.f32 %v852_v23, 0.0  ;;  %v1199_v29 = vmax.f32 %v942_v24, 0.0 }
 0x18e   :  { %v1342_v26 = vmax.f32 %v1234_v21, %v1270_v22 }
 0x18f   :  { %v1307_v37 = vmax.f32 %v1163_v28, %v1199_v29 }
 0x190   :  { %v1378_v27 = vmax.f32 %v1306_v25, %v1342_v26 }
 0x191   :  { %v1031_v30 = vpop.f32.mrf.mxu2  ;;  %v1121_v31 = vpop.f32.mrf.mxu3 }
 0x192   :  { %v1414_v32 = vpack.c.bf16 %v1378_v27, %v1378_v27  ;;  %v1032_v33 = vadd.f32 %v2435_v48, %v1031_v30  ;;  %v1122_v34 = vadd.f32 %v2435_v48, %v1121_v31  ;;  %v853_v35 = vpop.f32.mrf.mxu0  ;;  %v943_v36 = vpop.f32.mrf.mxu1 }
 0x193   :  { %v854_v41 = vadd.f32 %v2435_v48, %v853_v35  ;;  %v944_v43 = vadd.f32 %v2435_v48, %v943_v36 }
 0x194   :  { %1451 = vst.msk [vmem:[%s2530_s3 + $0x7c] sm:$0xf] %vm1419_vm3, %v1414_v32  ;;  %v1235_v38 = vmax.f32 %v1032_v33, 0.0  ;;  %v1271_v39 = vmax.f32 %v1122_v34, 0.0 }
 0x195   :  { %v1164_v45 = vmax.f32 %v854_v41, 0.0  ;;  %v1200_v50 = vmax.f32 %v944_v43, 0.0 }
 0x196   :  { %v1343_v42 = vmax.f32 %v1235_v38, %v1271_v39 }
 0x197   :  { %v1308_v58 = vmax.f32 %v1164_v45, %v1200_v50 }
 0x198   :  { %v1379_v44 = vmax.f32 %v1307_v37, %v1343_v42 }
 0x199   :  { %v1033_v46 = vpop.f32.mrf.mxu2  ;;  %v1123_v47 = vpop.f32.mrf.mxu3 }
 0x19a   :  { %v1415_v49 = vpack.c.bf16 %v1379_v44, %v1379_v44  ;;  %v1034_v51 = vadd.f32 %v2435_v48, %v1033_v46  ;;  %v1124_v52 = vadd.f32 %v2435_v48, %v1123_v47  ;;  %v856_v40 = vpop.f32.mrf.mxu0  ;;  %v946_v53 = vpop.f32.mrf.mxu1 }
 0x19b   :  { %v857_v56 = vadd.f32 %v2435_v48, %v856_v40  ;;  %v947_v57 = vadd.f32 %v2435_v48, %v946_v53 }
 0x19c   :  { %1452 = vst.msk [vmem:[%s2530_s3 + $0x80] sm:$0xf] %vm1419_vm3, %v1415_v49  ;;  %v1236_v54 = vmax.f32 %v1034_v51, 0.0  ;;  %v1272_v55 = vmax.f32 %v1124_v52, 0.0 }
 0x19d   :  { %v1165_v61 = vmax.f32 %v857_v56, 0.0  ;;  %v1201_v62 = vmax.f32 %v947_v57, 0.0 }
 0x19e   :  { %v1344_v59 = vmax.f32 %v1236_v54, %v1272_v55 }
 0x19f   :  { %v1309_v6 = vmax.f32 %v1165_v61, %v1201_v62 }
 0x1a0   :  { %v1380_v60 = vmax.f32 %v1308_v58, %v1344_v59 }
 0x1a1   :  { %v1036_v63 = vpop.f32.mrf.mxu2  ;;  %v1126_v0 = vpop.f32.mrf.mxu3 }
 0x1a2   :  { %v1416_v1 = vpack.c.bf16 %v1380_v60, %v1380_v60  ;;  %v1037_v2 = vadd.f32 %v2435_v48, %v1036_v63  ;;  %v1127_v3 = vadd.f32 %v2435_v48, %v1126_v0  ;;  %v858_v4 = vpop.f32.mrf.mxu0  ;;  %v948_v5 = vpop.f32.mrf.mxu1 }
 0x1a3   :  { %v859_v9 = vadd.f32 %v2435_v48, %v858_v4  ;;  %v949_v11 = vadd.f32 %v2435_v48, %v948_v5 }
 0x1a4   :  { %1453 = vst.msk [vmem:[%s2530_s3 + $0x84] sm:$0xf] %vm1419_vm3, %v1416_v1  ;;  %v1237_v7 = vmax.f32 %v1037_v2, 0.0  ;;  %v1273_v8 = vmax.f32 %v1127_v3, 0.0 }
 0x1a5   :  { %v1166_v13 = vmax.f32 %v859_v9, 0.0  ;;  %v1202_v17 = vmax.f32 %v949_v11, 0.0 }
 0x1a6   :  { %v1345_v10 = vmax.f32 %v1237_v7, %v1273_v8 }
 0x1a7   :  { %v1310_v22 = vmax.f32 %v1166_v13, %v1202_v17 }
 0x1a8   :  { %v1381_v12 = vmax.f32 %v1309_v6, %v1345_v10 }
 0x1a9   :  { %v1038_v14 = vpop.f32.mrf.mxu2  ;;  %v1128_v15 = vpop.f32.mrf.mxu3 }
 0x1aa   :  { %v1417_v16 = vpack.c.bf16 %v1381_v12, %v1381_v12  ;;  %v1039_v18 = vadd.f32 %v2435_v48, %v1038_v14  ;;  %v1129_v19 = vadd.f32 %v2435_v48, %v1128_v15 }
 0x1ac   :  { %1454 = vst.msk [vmem:[%s2530_s3 + $0x88] sm:$0xf] %vm1419_vm3, %v1417_v16  ;;  %v1238_v20 = vmax.f32 %v1039_v18, 0.0  ;;  %v1274_v21 = vmax.f32 %v1129_v19, 0.0 }
 0x1ae   :  { %v1346_v23 = vmax.f32 %v1238_v20, %v1274_v21 }
 0x1b0   :  { %v1382_v24 = vmax.f32 %v1310_v22, %v1346_v23 }
 0x1b2   :  { %v1418_v25 = vpack.c.bf16 %v1382_v24, %v1382_v24 }
 0x1b4   :  { %1455 = vst.msk [vmem:[%s2530_s3 + $0x8c] sm:$0xf] %vm1419_vm3, %v1418_v25 }

// kernel: number_network_forward.4
= control target key start
LH: loop header
LB: loop body
LE: loop exit
PB: predicated region body
PF: predicated region fallthrough
CT: control target
= control target key end

     0   :  { %vm336_vm0 = vcmask 1041408   ;;  %vm287_vm1 = vcmask 424960   ;;  %vm582_vm2 = vcmask 117760   ;;  %s1238_s1 = inlined_call_operand.vmem [shape: bf16[180,15], index: 1, kind: input, shape index: {}]   ;;  %s1239_s0 = inlined_call_operand.vmem [shape: bf16[256,180], index: 0, kind: input, shape index: {}]   ;;  %s1240_s2 = inlined_call_operand.vmem [shape: f32[1,15], index: 2, kind: input, shape index: {}]   ;;  %s1241_s3 = inlined_call_operand.vmem [shape: bf16[64,15], index: 3, kind: output, shape index: {}]  }
   0x1   :  { %v822_v0 = vld [vmem:[%s1238_s1 + $0x38] sm:$0xff]  ;;  %v821_v3 = vld [vmem:[%s1238_s1 + $0x30] sm:$0xff]  ;;  %v820_v7 = vld [vmem:[%s1238_s1 + $0x28] sm:$0xff] }
   0x2   :  { %v69_v1 = vld [vmem:[%s1238_s1 + $0x58] sm:$0x3]  ;;  %340 = vmatpush.bf16.msra.mxu0 %v822_v0  ;;  %826 = vmatpush.bf16.msra.mxu2 %v822_v0  ;;  %v825_v6 = vld [vmem:[%s1238_s1 + $0x50] sm:$0xff]  ;;  %v824_v8 = vld [vmem:[%s1238_s1 + $0x48] sm:$0xff] }
   0x3   :  { %v263_v2 = vunpack.c.l.b16 %v69_v1  ;;  %v819_v9 = vld [vmem:[%s1238_s1 + $0x20] sm:$0xff]  ;;  %v818_v11 = vld [vmem:[%s1238_s1 + $0x18] sm:$0xff]  ;;  %v599_v13 = vld [vmem:[%s1239_s0 + $0x8] sm:$0xf0] }
   0x4   :  { %v823_v10 = vld [vmem:[%s1238_s1 + $0x40] sm:$0xff]  ;;  %v801_v14 = vld [vmem:[%s1239_s0 + $0x94] sm:$0xf]  ;;  %v671_v15 = vld [vmem:[%s1239_s0 + $0x98] sm:$0xf0] }
   0x5   :  { %v275_v4 = vpack.c.b16 %v263_v2, %v263_v2  ;;  %v783_v12 = vld [vmem:[%s1239_s0 + $0x4] sm:$0xf]  ;;  %v817_v17 = vld [vmem:[%s1238_s1 + $0x10] sm:$0xff]  ;;  %v674_v18 = vor.u32 %v801_v14, %v671_v15  ;;  %v816_v19 = vld [vmem:[%s1238_s1 + $0x8] sm:$0xff] }
   0x6   :  { %341 = vmatpush.bf16.msra.mxu0 %v821_v3  ;;  %827 = vmatpush.bf16.msra.mxu2 %v821_v3  ;;  %v602_v16 = vor.u32 %v783_v12, %v599_v13  ;;  %v815_v20 = vld [vmem:[%s1238_s1] sm:$0xff]  ;;  %v784_v22 = vld [vmem:[%s1239_s0 + $0x4] sm:$0xf0]  ;;  %v785_v27 = vld [vmem:[%s1239_s0 + $0x14] sm:$0xf] }
   0x7   :  { %v338_v5 = vsel %vm336_vm0, %v275_v4, 0  ;;  %v597_v21 = vld [vmem:[%s1239_s0] sm:$0xf]  ;;  %v800_v24 = vld [vmem:[%s1239_s0 + $0x84] sm:$0xf0] }
   0x8   :  { %433 = vmatpush.bf16.msra.mxu1 %v338_v5  ;;  %834 = vmatpush.bf16.msra.mxu3 %v338_v5  ;;  %v661_v23 = vld [vmem:[%s1239_s0 + $0x80] sm:$0xf]  ;;  %v598_v25 = vor.u32 %v784_v22, %v597_v21  ;;  %v607_v28 = vld [vmem:[%s1239_s0 + $0x18] sm:$0xf0]  ;;  %v803_v29 = vld [vmem:[%s1239_s0 + $0xa4] sm:$0xf] }
   0x9   :  { %v662_v26 = vor.u32 %v800_v24, %v661_v23  ;;  %v679_v30 = vld [vmem:[%s1239_s0 + $0xa8] sm:$0xf0]  ;;  %v610_v31 = vor.u32 %v785_v27, %v607_v28  ;;  %v605_v33 = vld [vmem:[%s1239_s0 + $0x10] sm:$0xf]  ;;  %v786_v34 = vld [vmem:[%s1239_s0 + $0x14] sm:$0xf0] }
   0xa   :  { %342 = vmatpush.bf16.msra.mxu0 %v820_v7  ;;  %828 = vmatpush.bf16.msra.mxu2 %v820_v7  ;;  %v682_v32 = vor.u32 %v803_v29, %v679_v30  ;;  %v669_v35 = vld [vmem:[%s1239_s0 + $0x90] sm:$0xf]  ;;  %v802_v36 = vld [vmem:[%s1239_s0 + $0x94] sm:$0xf0]  ;;  %v606_v37 = vor.u32 %v786_v34, %v605_v33  ;;  %v787_v39 = vld [vmem:[%s1239_s0 + $0x24] sm:$0xf] }
   0xb   :  { %v670_v38 = vor.u32 %v802_v36, %v669_v35  ;;  %v615_v40 = vld [vmem:[%s1239_s0 + $0x28] sm:$0xf0]  ;;  %v805_v41 = vld [vmem:[%s1239_s0 + $0xb4] sm:$0xf]  ;;  %v687_v42 = vld [vmem:[%s1239_s0 + $0xb8] sm:$0xf0] }
   0xc   :  { %434 = vmatpush.bf16.msra.mxu1 %v825_v6  ;;  %835 = vmatpush.bf16.msra.mxu3 %v825_v6  ;;  %v618_v43 = vor.u32 %v787_v39, %v615_v40  ;;  %v690_v44 = vor.u32 %v805_v41, %v687_v42  ;;  %v613_v45 = vld [vmem:[%s1239_s0 + $0x20] sm:$0xf]  ;;  %v788_v46 = vld [vmem:[%s1239_s0 + $0x24] sm:$0xf0]  ;;  %v789_v51 = vld [vmem:[%s1239_s0 + $0x34] sm:$0xf] }
   0xd   :  { %v677_v47 = vld [vmem:[%s1239_s0 + $0xa0] sm:$0xf]  ;;  %v804_v48 = vld [vmem:[%s1239_s0 + $0xa4] sm:$0xf0]  ;;  %v614_v49 = vor.u32 %v788_v46, %v613_v45  ;;  %v623_v52 = vld [vmem:[%s1239_s0 + $0x38] sm:$0xf0] }
   0xe   :  { %343 = vmatpush.bf16.msra.mxu0 %v819_v9  ;;  %829 = vmatpush.bf16.msra.mxu2 %v819_v9  ;;  %v678_v50 = vor.u32 %v804_v48, %v677_v47  ;;  %v807_v53 = vld [vmem:[%s1239_s0 + $0xc4] sm:$0xf]  ;;  %v695_v54 = vld [vmem:[%s1239_s0 + $0xc8] sm:$0xf0]  ;;  %v626_v55 = vor.u32 %v789_v51, %v623_v52  ;;  %v621_v57 = vld [vmem:[%s1239_s0 + $0x30] sm:$0xf] }
   0xf   :  { %v698_v56 = vor.u32 %v807_v53, %v695_v54  ;;  %v790_v58 = vld [vmem:[%s1239_s0 + $0x34] sm:$0xf0]  ;;  %v685_v59 = vld [vmem:[%s1239_s0 + $0xb0] sm:$0xf]  ;;  %v791_v63 = vld [vmem:[%s1239_s0 + $0x44] sm:$0xf] }
  0x10   :  { %435 = vmatpush.bf16.msra.mxu1 %v824_v8  ;;  %836 = vmatpush.bf16.msra.mxu3 %v824_v8  ;;  %v806_v60 = vld [vmem:[%s1239_s0 + $0xb4] sm:$0xf0]  ;;  %v622_v61 = vor.u32 %v790_v58, %v621_v57  ;;  %v631_v0 = vld [vmem:[%s1239_s0 + $0x48] sm:$0xf0]  ;;  %v809_v1 = vld [vmem:[%s1239_s0 + $0xd4] sm:$0xf] }
  0x11   :  { %v686_v62 = vor.u32 %v806_v60, %v685_v59  ;;  %v703_v2 = vld [vmem:[%s1239_s0 + $0xd8] sm:$0xf0]  ;;  %v634_v3 = vor.u32 %v791_v63, %v631_v0  ;;  %v629_v5 = vld [vmem:[%s1239_s0 + $0x40] sm:$0xf]  ;;  %v792_v6 = vld [vmem:[%s1239_s0 + $0x44] sm:$0xf0] }
  0x12   :  { %344 = vmatpush.bf16.msra.mxu0 %v818_v11  ;;  %830 = vmatpush.bf16.msra.mxu2 %v818_v11  ;;  %v706_v4 = vor.u32 %v809_v1, %v703_v2  ;;  %v693_v7 = vld [vmem:[%s1239_s0 + $0xc0] sm:$0xf]  ;;  %v808_v8 = vld [vmem:[%s1239_s0 + $0xc4] sm:$0xf0]  ;;  %v630_v9 = vor.u32 %v792_v6, %v629_v5  ;;  %v793_v11 = vld [vmem:[%s1239_s0 + $0x54] sm:$0xf] }
  0x13   :  { %v639_v12 = vld [vmem:[%s1239_s0 + $0x58] sm:$0xf0]  ;;  %v811_v13 = vld [vmem:[%s1239_s0 + $0xe4] sm:$0xf]  ;;  %v711_v14 = vld [vmem:[%s1239_s0 + $0xe8] sm:$0xf0] }
  0x14   :  { %436 = vmatpush.bf16.msra.mxu1 %v823_v10  ;;  %837 = vmatpush.bf16.msra.mxu3 %v823_v10  ;;  %v694_v10 = vor.u32 %v808_v8, %v693_v7  ;;  %v642_v15 = vor.u32 %v793_v11, %v639_v12  ;;  %v795_v23 = vld [vmem:[%s1239_s0 + $0x64] sm:$0xf]  ;;  %v647_v24 = vld [vmem:[%s1239_s0 + $0x68] sm:$0xf0]  ;;  %v645_v29 = vld [vmem:[%s1239_s0 + $0x60] sm:$0xf] }
  0x15   :  { %v650_v27 = vor.u32 %v795_v23, %v647_v24  ;;  %v796_v30 = vld [vmem:[%s1239_s0 + $0x64] sm:$0xf0]  ;;  %v797_v35 = vld [vmem:[%s1239_s0 + $0x74] sm:$0xf]  ;;  %v655_v36 = vld [vmem:[%s1239_s0 + $0x78] sm:$0xf0] }
  0x16   :  { %345 = vmatpush.bf16.msra.mxu0 %v817_v17  ;;  %831 = vmatpush.bf16.msra.mxu2 %v817_v17  ;;  %v637_v17 = vld [vmem:[%s1239_s0 + $0x50] sm:$0xf]  ;;  %v646_v33 = vor.u32 %v796_v30, %v645_v29  ;;  %v798_v39 = vld [vmem:[%s1239_s0 + $0x74] sm:$0xf0]  ;;  %v663_v45 = vld [vmem:[%s1239_s0 + $0x88] sm:$0xf0] }
  0x17   :  { %767 = vmatmul.msk.bf16.vlgmr.msra.gmra.mxu1 %vm287_vm1, %v602_v16  ;;  %776 = vmatmul.msk.bf16.vlgmr.msra.gmra.mxu3 %vm287_vm1, %v674_v18  ;;  %v714_v16 = vor.u32 %v811_v13, %v711_v14  ;;  %v794_v18 = vld [vmem:[%s1239_s0 + $0x54] sm:$0xf0]  ;;  %v717_v40 = vld [vmem:[%s1239_s0 + $0xf0] sm:$0xf] }
  0x18   :  { %v638_v21 = vor.u32 %v794_v18, %v637_v17  ;;  %v814_v41 = vld [vmem:[%s1239_s0 + $0xf4] sm:$0xf0] }
  0x1a   :  { %346 = vmatpush.bf16.msra.mxu0 %v816_v19  ;;  %832 = vmatpush.bf16.msra.mxu2 %v816_v19  ;;  %v701_v19 = vld [vmem:[%s1239_s0 + $0xd0] sm:$0xf] }
  0x1e   :  { %347 = vmatpush.bf16.msra.mxu0 %v815_v20  ;;  %833 = vmatpush.bf16.msra.mxu2 %v815_v20  ;;  %v810_v20 = vld [vmem:[%s1239_s0 + $0xd4] sm:$0xf0] }
  0x1f   :  { %v702_v22 = vor.u32 %v810_v20, %v701_v19 }
  0x21   :  { %348 = vmatmul.bf16.vlgmr.msra.gmra.mxu0 %v598_v25  ;;  %388 = vmatmul.bf16.vlgmr.msra.gmra.mxu2 %v662_v26  ;;  %v813_v25 = vld [vmem:[%s1239_s0 + $0xf4] sm:$0xf]  ;;  %v719_v26 = vld [vmem:[%s1239_s0 + $0xf8] sm:$0xf0] }
  0x22   :  { %v722_v28 = vor.u32 %v813_v25, %v719_v26 }
  0x27   :  { %768 = vmatmul.msk.bf16.gmra.mxu1 %vm287_vm1, %v610_v31  ;;  %777 = vmatmul.msk.bf16.gmra.mxu3 %vm287_vm1, %v682_v32  ;;  %v709_v31 = vld [vmem:[%s1239_s0 + $0xe0] sm:$0xf]  ;;  %v812_v32 = vld [vmem:[%s1239_s0 + $0xe4] sm:$0xf0] }
  0x28   :  { %v710_v34 = vor.u32 %v812_v32, %v709_v31 }
  0x31   :  { %353 = vmatmul.bf16.gmra.mxu0 %v606_v37  ;;  %393 = vmatmul.bf16.gmra.mxu2 %v670_v38  ;;  %v658_v37 = vor.u32 %v797_v35, %v655_v36  ;;  %v653_v38 = vld [vmem:[%s1239_s0 + $0x70] sm:$0xf] }
  0x32   :  { %v654_v42 = vor.u32 %v798_v39, %v653_v38 }
  0x37   :  { %769 = vmatmul.msk.bf16.gmra.mxu1 %vm287_vm1, %v618_v43  ;;  %778 = vmatmul.msk.bf16.gmra.mxu3 %vm287_vm1, %v690_v44  ;;  %v718_v43 = vor.u32 %v814_v41, %v717_v40  ;;  %v799_v44 = vld [vmem:[%s1239_s0 + $0x84] sm:$0xf] }
  0x38   :  { %v666_v46 = vor.u32 %v799_v44, %v663_v45 }
  0x41   :  { %358 = vmatmul.bf16.gmra.mxu0 %v614_v49  ;;  %398 = vmatmul.bf16.gmra.mxu2 %v678_v50  ;;  %v1106_v49 = vld [vmem:[%s1240_s2] ss:$0 sm:$0xff] }
  0x47   :  { %770 = vmatmul.msk.bf16.gmra.mxu1 %vm287_vm1, %v626_v55  ;;  %779 = vmatmul.msk.bf16.gmra.mxu3 %vm287_vm1, %v698_v56 }
  0x51   :  { %363 = vmatmul.bf16.gmra.mxu0 %v622_v61  ;;  %403 = vmatmul.bf16.gmra.mxu2 %v686_v62 }
  0x57   :  { %771 = vmatmul.msk.bf16.gmra.mxu1 %vm287_vm1, %v634_v3  ;;  %780 = vmatmul.msk.bf16.gmra.mxu3 %vm287_vm1, %v706_v4 }
  0x61   :  { %368 = vmatmul.bf16.gmra.mxu0 %v630_v9  ;;  %408 = vmatmul.bf16.gmra.mxu2 %v694_v10 }
  0x67   :  { %772 = vmatmul.msk.bf16.gmra.mxu1 %vm287_vm1, %v642_v15  ;;  %781 = vmatmul.msk.bf16.gmra.mxu3 %vm287_vm1, %v714_v16 }
  0x71   :  { %373 = vmatmul.bf16.gmra.mxu0 %v638_v21  ;;  %413 = vmatmul.bf16.gmra.mxu2 %v702_v22 }
  0x77   :  { %773 = vmatmul.msk.bf16.gmra.mxu1 %vm287_vm1, %v650_v27  ;;  %782 = vmatmul.msk.bf16.gmra.mxu3 %vm287_vm1, %v722_v28 }
  0x81   :  { %378 = vmatmul.bf16.gmra.mxu0 %v646_v33  ;;  %418 = vmatmul.bf16.gmra.mxu2 %v710_v34 }
  0x87   :  { %774 = vmatmul.msk.bf16.gmra.mxu1 %vm287_vm1, %v658_v37 }
  0x91   :  { %383 = vmatmul.bf16.gmra.mxu0 %v654_v42  ;;  %423 = vmatmul.bf16.gmra.mxu2 %v718_v43 }
  0x94   :  { %v438_v47 = vpop.f32.mrf.mxu1 }
  0x97   :  { %775 = vmatmul.msk.bf16.gmra.mxu1 %vm287_vm1, %v666_v46 }
  0x9a   :  { %v483_v50 = vpop.f32.mrf.mxu3 }
  0x9c   :  { %v440_v48 = vpop.f32.mrf.mxu1 }
  0x9e   :  { %v349_v51 = vpop.f32.mrf.mxu0 }
  0x9f   :  { %v350_v52 = vadd.f32 %v1106_v49, %v349_v51 }
  0xa1   :  { %v1109_v53 = vadd.f32 %v438_v47, %v350_v52 }
  0xa2   :  { %v485_v58 = vpop.f32.mrf.mxu3 }
  0xa4   :  { %v443_v54 = vpop.f32.mrf.mxu1  ;;  %v1111_v55 = vpop.f32.mrf.mxu2 }
  0xa6   :  { %v351_v56 = vpop.f32.mrf.mxu0 }
  0xa7   :  { %v352_v57 = vadd.f32 %v1106_v49, %v351_v56 }
  0xa9   :  { %v1114_v59 = vadd.f32 %v440_v48, %v352_v57 }
  0xaa   :  { %v488_v1 = vpop.f32.mrf.mxu3 }
  0xac   :  { %v445_v60 = vpop.f32.mrf.mxu1  ;;  %v1116_v61 = vpop.f32.mrf.mxu2 }
  0xae   :  { %v354_v62 = vpop.f32.mrf.mxu0 }
  0xaf   :  { %v355_v63 = vadd.f32 %v1106_v49, %v354_v62 }
  0xb1   :  { %v1119_v0 = vadd.f32 %v443_v54, %v355_v63  ;;  %v519_v63 = vmax.f32 %v1114_v59, 0.0 }
  0xb2   :  { %v490_v10 = vpop.f32.mrf.mxu3 }
  0xb4   :  { %v448_v2 = vpop.f32.mrf.mxu1  ;;  %v394_v3 = vpop.f32.mrf.mxu2 }
  0xb5   :  { %v395_v4 = vadd.f32 %v1106_v49, %v394_v3 }
  0xb6   :  { %v356_v5 = vpop.f32.mrf.mxu0 }
  0xb7   :  { %v357_v6 = vadd.f32 %v1106_v49, %v356_v5  ;;  %v1123_v7 = vadd.f32 %v483_v50, %v395_v4  ;;  %v518_v50 = vmax.f32 %v1109_v53, 0.0 }
  0xb9   :  { %v1125_v8 = vadd.f32 %v445_v60, %v357_v6 }
  0xba   :  { %v493_v19 = vpop.f32.mrf.mxu3 }
  0xbc   :  { %v450_v9 = vpop.f32.mrf.mxu1  ;;  %v396_v11 = vpop.f32.mrf.mxu2 }
  0xbd   :  { %v397_v12 = vadd.f32 %v1106_v49, %v396_v11 }
  0xbe   :  { %v359_v13 = vpop.f32.mrf.mxu0 }
  0xbf   :  { %v360_v14 = vadd.f32 %v1106_v49, %v359_v13  ;;  %v1129_v15 = vadd.f32 %v485_v58, %v397_v12 }
  0xc1   :  { %v1131_v16 = vadd.f32 %v448_v2, %v360_v14 }
  0xc2   :  { %v495_v30 = vpop.f32.mrf.mxu3 }
  0xc4   :  { %v453_v17 = vpop.f32.mrf.mxu1  ;;  %v399_v18 = vpop.f32.mrf.mxu2 }
  0xc5   :  { %v400_v20 = vadd.f32 %v1106_v49, %v399_v18  ;;  %v520_v18 = vmax.f32 %v1119_v0, 0.0  ;;  %v521_v0 = vmax.f32 %v1125_v8, 0.0 }
  0xc6   :  { %v361_v21 = vpop.f32.mrf.mxu0 }
  0xc7   :  { %v362_v22 = vadd.f32 %v1106_v49, %v361_v21  ;;  %v1135_v23 = vadd.f32 %v488_v1, %v400_v20 }
  0xc9   :  { %v1137_v24 = vadd.f32 %v450_v9, %v362_v22 }
  0xca   :  { %v1151_v40 = vpop.f32.mrf.mxu3 }
  0xcc   :  { %v455_v25 = vpop.f32.mrf.mxu1  ;;  %v401_v26 = vpop.f32.mrf.mxu2 }
  0xcd   :  { %v402_v27 = vadd.f32 %v1106_v49, %v401_v26 }
  0xce   :  { %v364_v28 = vpop.f32.mrf.mxu0 }
  0xcf   :  { %v365_v29 = vadd.f32 %v1106_v49, %v364_v28  ;;  %v1141_v31 = vadd.f32 %v490_v10, %v402_v27 }
  0xd1   :  { %v1143_v32 = vadd.f32 %v453_v17, %v365_v29 }
  0xd2   :  { %v1158_v52 = vpop.f32.mrf.mxu3 }
  0xd4   :  { %v458_v33 = vpop.f32.mrf.mxu1  ;;  %v404_v34 = vpop.f32.mrf.mxu2 }
  0xd5   :  { %v405_v35 = vadd.f32 %v1106_v49, %v404_v34 }
  0xd6   :  { %v366_v36 = vpop.f32.mrf.mxu0 }
  0xd7   :  { %v367_v37 = vadd.f32 %v1106_v49, %v366_v36  ;;  %v1147_v38 = vadd.f32 %v493_v19, %v405_v35  ;;  %v536_v19 = vmax.f32 %v1123_v7, 0.0  ;;  %v537_v7 = vmax.f32 %v1129_v15, 0.0 }
  0xd9   :  { %v1149_v39 = vadd.f32 %v455_v25, %v367_v37 }
  0xda   :  { %v503_v53 = vpop.f32.mrf.mxu3 }
  0xdc   :  { %v460_v41 = vpop.f32.mrf.mxu1  ;;  %v406_v42 = vpop.f32.mrf.mxu2 }
  0xdd   :  { %v407_v43 = vadd.f32 %v1106_v49, %v406_v42 }
  0xde   :  { %v369_v44 = vpop.f32.mrf.mxu0 }
  0xdf   :  { %v370_v45 = vadd.f32 %v1106_v49, %v369_v44  ;;  %v1155_v46 = vadd.f32 %v495_v30, %v407_v43 }
  0xe1   :  { %v459_v47 = vadd.f32 %v458_v33, %v370_v45 }
  0xe2   :  { %v505_v13 = vpop.f32.mrf.mxu3 }
  0xe3   :  { %v526_v51 = vmax.f32 %v459_v47, 0.0 }
  0xe4   :  { %v463_v48 = vpop.f32.mrf.mxu1  ;;  %v1162_v56 = vpop.f32.mrf.mxu2 }
  0xe5   :  { %v1160_v54 = vmax.f32 %v518_v50, %v526_v51 }
  0xe6   :  { %v371_v57 = vpop.f32.mrf.mxu0 }
  0xe7   :  { %v372_v58 = vadd.f32 %v1106_v49, %v371_v57 }
  0xe9   :  { %v461_v60 = vadd.f32 %v460_v41, %v372_v58 }
  0xea   :  { %v508_v37 = vpop.f32.mrf.mxu3 }
  0xeb   :  { %v527_v1 = vmax.f32 %v461_v60, 0.0  ;;  %v522_v60 = vmax.f32 %v1131_v16, 0.0 }
  0xec   :  { %v465_v62 = vpop.f32.mrf.mxu1  ;;  %v1168_v3 = vpop.f32.mrf.mxu2 }
  0xed   :  { %v1166_v2 = vmax.f32 %v519_v63, %v527_v1 }
  0xee   :  { %v374_v4 = vpop.f32.mrf.mxu0 }
  0xef   :  { %v375_v5 = vadd.f32 %v1106_v49, %v374_v4 }
  0xf1   :  { %v464_v9 = vadd.f32 %v463_v48, %v375_v5 }
  0xf3   :  { %v528_v14 = vmax.f32 %v464_v9, 0.0  ;;  %v410_v9 = vadd.f32 %v1106_v49, %v1162_v56 }
  0xf4   :  { %v468_v6 = vpop.f32.mrf.mxu1  ;;  %v414_v10 = vpop.f32.mrf.mxu2 }
  0xf5   :  { %v415_v11 = vadd.f32 %v1106_v49, %v414_v10  ;;  %v552_v22 = vmax.f32 %v520_v18, %v528_v14  ;;  %v499_v18 = vadd.f32 %v1151_v40, %v410_v9 }
  0xf6   :  { %v376_v12 = vpop.f32.mrf.mxu0 }
  0xf7   :  { %v504_v17 = vadd.f32 %v503_v53, %v415_v11  ;;  %v377_v59 = vadd.f32 %v1106_v49, %v376_v12  ;;  %v510_v53 = vpop.f32.mrf.mxu3 }
  0xf9   :  { %v544_v20 = vmax.f32 %v504_v17, 0.0  ;;  %v466_v26 = vadd.f32 %v465_v62, %v377_v59  ;;  %v538_v62 = vmax.f32 %v1135_v23, 0.0  ;;  %v390_v59 = vadd.f32 %v1106_v49, %v1111_v55 }
  0xfa   :  { %v412_v55 = vadd.f32 %v1106_v49, %v1168_v3 }
  0xfb   :  { %v560_v25 = vmax.f32 %v536_v19, %v544_v20  ;;  %v529_v34 = vmax.f32 %v466_v26, 0.0  ;;  %v523_v19 = vmax.f32 %v1137_v24, 0.0  ;;  %v539_v20 = vmax.f32 %v1141_v31, 0.0 }
  0xfc   :  { %v470_v21 = vpop.f32.mrf.mxu1  ;;  %v416_v27 = vpop.f32.mrf.mxu2 }
  0xfd   :  { %v568_v28 = vmax.f32 %v552_v22, %v560_v25  ;;  %v417_v29 = vadd.f32 %v1106_v49, %v416_v27  ;;  %v553_v43 = vmax.f32 %v521_v0, %v529_v34 }
  0xfe   :  { %v379_v30 = vpop.f32.mrf.mxu0 }
  0xff   :  { %v576_v33 = vpack.c.bf16 %v568_v28, %v568_v28  ;;  %v506_v35 = vadd.f32 %v505_v13, %v417_v29  ;;  %v380_v36 = vadd.f32 %v1106_v49, %v379_v30  ;;  %v542_v28 = vmax.f32 %v499_v18, 0.0  ;;  %v513_v40 = vpop.f32.mrf.mxu3 }
 0x101   :  { %585 = vst.msk [vmem:[%s1241_s3 + $0x8] sm:$0xf] %vm582_vm2, %v576_v33  ;;  %v545_v41 = vmax.f32 %v506_v35, 0.0  ;;  %v469_v45 = vadd.f32 %v468_v6, %v380_v36 }
 0x103   :  { %v561_v44 = vmax.f32 %v537_v7, %v545_v41  ;;  %v530_v58 = vmax.f32 %v469_v45, 0.0  ;;  %v392_v7 = vadd.f32 %v1106_v49, %v1116_v61  ;;  %v501_v41 = vadd.f32 %v1158_v52, %v412_v55 }
 0x104   :  { %v473_v42 = vpop.f32.mrf.mxu1  ;;  %v419_v47 = vpop.f32.mrf.mxu2 }
 0x105   :  { %v569_v48 = vmax.f32 %v553_v43, %v561_v44  ;;  %v420_v50 = vadd.f32 %v1106_v49, %v419_v47  ;;  %v554_v4 = vmax.f32 %v522_v60, %v530_v58  ;;  %v540_v43 = vmax.f32 %v1147_v38, 0.0 }
 0x106   :  { %v381_v51 = vpop.f32.mrf.mxu0 }
 0x107   :  { %v577_v57 = vpack.c.bf16 %v569_v48, %v569_v48  ;;  %v509_v8 = vadd.f32 %v508_v37, %v420_v50  ;;  %v382_v15 = vadd.f32 %v1106_v49, %v381_v51  ;;  %v515_v58 = vpop.f32.mrf.mxu3 }
 0x109   :  { %586 = vst.msk [vmem:[%s1241_s3 + $0xc] sm:$0xf] %vm582_vm2, %v577_v57  ;;  %v546_v63 = vmax.f32 %v509_v8, 0.0  ;;  %v471_v6 = vadd.f32 %v470_v21, %v382_v15  ;;  %v543_v57 = vmax.f32 %v501_v41, 0.0 }
 0x10b   :  { %v562_v5 = vmax.f32 %v538_v62, %v546_v63  ;;  %v531_v13 = vmax.f32 %v471_v6, 0.0 }
 0x10c   :  { %v475_v1 = vpop.f32.mrf.mxu1  ;;  %v421_v10 = vpop.f32.mrf.mxu2 }
 0x10d   :  { %v570_v11 = vmax.f32 %v554_v4, %v562_v5  ;;  %v422_v16 = vadd.f32 %v1106_v49, %v421_v10  ;;  %v555_v25 = vmax.f32 %v523_v19, %v531_v13 }
 0x10e   :  { %v384_v12 = vpop.f32.mrf.mxu0 }
 0x10f   :  { %v578_v23 = vpack.c.bf16 %v570_v11, %v570_v11  ;;  %v511_v14 = vadd.f32 %v510_v53, %v422_v16  ;;  %v385_v17 = vadd.f32 %v1106_v49, %v384_v12  ;;  %v541_v53 = vmax.f32 %v1155_v46, 0.0 }
 0x111   :  { %587 = vst.msk [vmem:[%s1241_s3 + $0x10] sm:$0xf] %vm582_vm2, %v578_v23  ;;  %v547_v56 = vmax.f32 %v511_v14, 0.0  ;;  %v474_v27 = vadd.f32 %v473_v42, %v385_v17  ;;  %v524_v42 = vmax.f32 %v1143_v32, 0.0 }
 0x113   :  { %v563_v26 = vmax.f32 %v539_v20, %v547_v56  ;;  %v532_v36 = vmax.f32 %v474_v27, 0.0 }
 0x114   :  { %v478_v21 = vpop.f32.mrf.mxu1  ;;  %v424_v24 = vpop.f32.mrf.mxu2 }
 0x115   :  { %v479_v22 = vadd.f32 %v478_v21, %v390_v59  ;;  %v571_v30 = vmax.f32 %v555_v25, %v563_v26  ;;  %v425_v31 = vadd.f32 %v1106_v49, %v424_v24  ;;  %v556_v50 = vmax.f32 %v524_v42, %v532_v36 }
 0x116   :  { %v386_v33 = vpop.f32.mrf.mxu0 }
 0x117   :  { %v534_v29 = vmax.f32 %v479_v22, 0.0  ;;  %v579_v35 = vpack.c.bf16 %v571_v30, %v571_v30  ;;  %v514_v37 = vadd.f32 %v513_v40, %v425_v31  ;;  %v387_v0 = vadd.f32 %v1106_v49, %v386_v33 }
 0x119   :  { %v558_v34 = vmax.f32 %v534_v29, %v542_v28  ;;  %588 = vst.msk [vmem:[%s1241_s3 + $0x14] sm:$0xf] %vm582_vm2, %v579_v35  ;;  %v548_v44 = vmax.f32 %v514_v37, 0.0  ;;  %v476_v61 = vadd.f32 %v475_v1, %v387_v0  ;;  %v525_v1 = vmax.f32 %v1149_v39, 0.0 }
 0x11b   :  { %v566_v3 = vmax.f32 %v1160_v54, %v558_v34  ;;  %v564_v51 = vmax.f32 %v540_v43, %v548_v44  ;;  %v533_v60 = vmax.f32 %v476_v61, 0.0 }
 0x11c   :  { %v480_v45 = vpop.f32.mrf.mxu1  ;;  %v426_v38 = vpop.f32.mrf.mxu2 }
 0x11d   :  { %v574_v47 = vpack.c.bf16 %v566_v3, %v566_v3  ;;  %v481_v48 = vadd.f32 %v480_v45, %v392_v7  ;;  %v572_v52 = vmax.f32 %v556_v50, %v564_v51  ;;  %v427_v54 = vadd.f32 %v1106_v49, %v426_v38 }
 0x11e   :  { %v557_v6 = vmax.f32 %v525_v1, %v533_v60 }
 0x11f   :  { %583 = vst.msk [vmem:[%s1241_s3] sm:$0xf] %vm582_vm2, %v574_v47  ;;  %v535_v32 = vmax.f32 %v481_v48, 0.0  ;;  %v580_v15 = vpack.c.bf16 %v572_v52, %v572_v52  ;;  %v516_v62 = vadd.f32 %v515_v58, %v427_v54 }
 0x121   :  { %v559_v8 = vmax.f32 %v535_v32, %v543_v57  ;;  %589 = vst.msk [vmem:[%s1241_s3 + $0x18] sm:$0xf] %vm582_vm2, %v580_v15  ;;  %v549_v4 = vmax.f32 %v516_v62, 0.0 }
 0x123   :  { %v567_v63 = vmax.f32 %v1166_v2, %v559_v8  ;;  %v565_v49 = vmax.f32 %v541_v53, %v549_v4 }
 0x125   :  { %v575_v5 = vpack.c.bf16 %v567_v63, %v567_v63  ;;  %v573_v9 = vmax.f32 %v557_v6, %v565_v49 }
 0x127   :  { %584 = vst.msk [vmem:[%s1241_s3 + $0x4] sm:$0xf] %vm582_vm2, %v575_v5  ;;  %v581_v2 = vpack.c.bf16 %v573_v9, %v573_v9 }
 0x129   :  { %590 = vst.msk [vmem:[%s1241_s3 + $0x1c] sm:$0xf] %vm582_vm2, %v581_v2 }

// kernel: number_network_forward.5
= control target key start
LH: loop header
LB: loop body
LE: loop exit
PB: predicated region body
PF: predicated region fallthrough
CT: control target
= control target key end

     0   :  { %vm333_vm0 = vcmask 1042432   ;;  %vm334_vm1 = vcmask 1043456   ;;  %v1056_v14 = vmov 65535   ;;  %vm330_vm2 = vcmask 973824   ;;  %s1487_s0 = inlined_call_operand.vmem [shape: bf16[2,375], index: 0, kind: input, shape index: {}]   ;;  %s1488_s1 = inlined_call_operand.vmem [shape: bf16[375,140], index: 1, kind: input, shape index: {}]   ;;  %s1489_s2 = inlined_call_operand.vmem [shape: f32[1,140], index: 2, kind: input, shape index: {}]   ;;  %s1490_s3 = inlined_call_operand.vmem [shape: bf16[140,100], index: 3, kind: input, shape index: {}]   ;;  %s1491_s4 = inlined_call_operand.vmem [shape: f32[1,100], index: 4, kind: input, shape index: {}]   ;;  %s1492_s5 = inlined_call_operand.vmem [shape: bf16[100,54], index: 5, kind: input, shape index: {}]   ;;  %s1493_s6 = inlined_call_operand.vmem [shape: f32[1,54], index: 6, kind: input, shape index: {}]   ;;  %s1494_s7 = inlined_call_operand.vmem [shape: bf16[54,9], index: 7, kind: input, shape index: {}]   ;;  %s1495_s8 = inlined_call_operand.vmem [shape: f32[1,9], index: 8, kind: input, shape index: {}]   ;;  %s1496_s9 = inlined_call_operand.hbm [shape: f32[2,9], index: 9, kind: output, shape index: {}]  }
   0x1   :  { %v754_v0 = vld [vmem:[%s1488_s1 + $0x70] sm:$0xf]  ;;  %v972_v1 = vld [vmem:[%s1488_s1 + $0x74] sm:$0xf0]  ;;  %v746_v5 = vld [vmem:[%s1488_s1 + $0x60] sm:$0xf] }
   0x2   :  { %v818_v2 = vld [vmem:[%s1488_s1 + $0xf0] sm:$0xf]  ;;  %v755_v3 = vor.u32 %v972_v1, %v754_v0  ;;  %v988_v4 = vld [vmem:[%s1488_s1 + $0xf4] sm:$0xf0]  ;;  %v970_v6 = vld [vmem:[%s1488_s1 + $0x64] sm:$0xf0] }
   0x3   :  { %v819_v7 = vor.u32 %v988_v4, %v818_v2  ;;  %v810_v8 = vld [vmem:[%s1488_s1 + $0xe0] sm:$0xf]  ;;  %v986_v9 = vld [vmem:[%s1488_s1 + $0xe4] sm:$0xf0]  ;;  %v1135_v10 = vld [vmem:[%s1488_s1 + $0x170] sm:$0xff]  ;;  %v747_v11 = vor.u32 %v970_v6, %v746_v5  ;;  %v335_v15 = vsel %vm333_vm0, 4294967295, %v1056_v14 }
   0x4   :  { %343 = vmatpush.bf16.msra.mxu0 %v755_v3  ;;  %v234_v12 = vunpack.c.l.b16 %v1135_v10  ;;  %v811_v13 = vor.u32 %v986_v9, %v810_v8  ;;  %v738_v16 = vld [vmem:[%s1488_s1 + $0x50] sm:$0xf]  ;;  %v968_v17 = vld [vmem:[%s1488_s1 + $0x54] sm:$0xf0]  ;;  %v1145_v19 = vsel %vm334_vm1, %v335_v15, 0  ;;  %v235_v9 = vunpack.c.h.b16 %v1135_v10 }
   0x5   :  { %356 = vmatpush.bf16.msra.mxu1 %v819_v7  ;;  %v802_v20 = vld [vmem:[%s1488_s1 + $0xd0] sm:$0xf]  ;;  %v984_v21 = vld [vmem:[%s1488_s1 + $0xd4] sm:$0xf0]  ;;  %v874_v22 = vld [vmem:[%s1488_s1 + $0x160] sm:$0xf]  ;;  %v739_v25 = vor.u32 %v968_v17, %v738_v16 }
   0x6   :  { %v282_v18 = vpack.c.b16 %v234_v12, %v234_v12  ;;  %v1002_v23 = vld [vmem:[%s1488_s1 + $0x164] sm:$0xf0]  ;;  %v730_v26 = vld [vmem:[%s1488_s1 + $0x40] sm:$0xf]  ;;  %v803_v27 = vor.u32 %v984_v21, %v802_v20  ;;  %v971_v29 = vld [vmem:[%s1488_s1 + $0x74] sm:$0xf] }
   0x7   :  { %v966_v28 = vld [vmem:[%s1488_s1 + $0x44] sm:$0xf0]  ;;  %v756_v30 = vld [vmem:[%s1488_s1 + $0x78] sm:$0xf0]  ;;  %v875_v31 = vor.u32 %v1002_v23, %v874_v22  ;;  %v794_v32 = vld [vmem:[%s1488_s1 + $0xc0] sm:$0xf] }
   0x8   :  { %344 = vmatpush.bf16.msra.mxu0 %v747_v11  ;;  %v338_v24 = vand.u32 %v1145_v19, %v282_v18  ;;  %v982_v33 = vld [vmem:[%s1488_s1 + $0xc4] sm:$0xf0]  ;;  %v759_v34 = vor.u32 %v971_v29, %v756_v30  ;;  %v866_v35 = vld [vmem:[%s1488_s1 + $0x150] sm:$0xf]  ;;  %v1000_v36 = vld [vmem:[%s1488_s1 + $0x154] sm:$0xf0]  ;;  %v731_v38 = vor.u32 %v966_v28, %v730_v26  ;;  %v283_v26 = vpack.c.b16 %v235_v9, %v235_v9 }
   0x9   :  { %357 = vmatpush.bf16.msra.mxu1 %v811_v13  ;;  %v969_v37 = vld [vmem:[%s1488_s1 + $0x64] sm:$0xf]  ;;  %v748_v39 = vld [vmem:[%s1488_s1 + $0x68] sm:$0xf0]  ;;  %v795_v40 = vor.u32 %v982_v33, %v794_v32  ;;  %v722_v41 = vld [vmem:[%s1488_s1 + $0x30] sm:$0xf]  ;;  %v867_v45 = vor.u32 %v1000_v36, %v866_v35 }
   0xa   :  { %369 = vmatpush.bf16.msra.mxu2 %v338_v24  ;;  %382 = vmatpush.bf16.msra.mxu3 %v759_v34  ;;  %v964_v42 = vld [vmem:[%s1488_s1 + $0x34] sm:$0xf0]  ;;  %v786_v43 = vld [vmem:[%s1488_s1 + $0xb0] sm:$0xf]  ;;  %v751_v44 = vor.u32 %v969_v37, %v748_v39  ;;  %v967_v47 = vld [vmem:[%s1488_s1 + $0x54] sm:$0xf]  ;;  %v341_v36 = vand.u32 %v1145_v19, %v283_v26 }
   0xb   :  { %v980_v46 = vld [vmem:[%s1488_s1 + $0xb4] sm:$0xf0]  ;;  %v740_v48 = vld [vmem:[%s1488_s1 + $0x58] sm:$0xf0]  ;;  %v858_v49 = vld [vmem:[%s1488_s1 + $0x140] sm:$0xf]  ;;  %v723_v51 = vor.u32 %v964_v42, %v722_v41 }
   0xc   :  { %345 = vmatpush.bf16.msra.mxu0 %v739_v25  ;;  %v998_v50 = vld [vmem:[%s1488_s1 + $0x144] sm:$0xf0]  ;;  %v714_v52 = vld [vmem:[%s1488_s1 + $0x20] sm:$0xf]  ;;  %v743_v53 = vor.u32 %v967_v47, %v740_v48  ;;  %v787_v54 = vor.u32 %v980_v46, %v786_v43  ;;  %v965_v56 = vld [vmem:[%s1488_s1 + $0x44] sm:$0xf] }
   0xd   :  { %358 = vmatpush.bf16.msra.mxu1 %v803_v27  ;;  %v962_v55 = vld [vmem:[%s1488_s1 + $0x24] sm:$0xf0]  ;;  %v732_v57 = vld [vmem:[%s1488_s1 + $0x48] sm:$0xf0]  ;;  %v859_v58 = vor.u32 %v998_v50, %v858_v49  ;;  %v778_v59 = vld [vmem:[%s1488_s1 + $0xa0] sm:$0xf] }
   0xe   :  { %370 = vmatpush.bf16.msra.mxu2 %v875_v31  ;;  %383 = vmatpush.bf16.msra.mxu3 %v751_v44  ;;  %v978_v60 = vld [vmem:[%s1488_s1 + $0xa4] sm:$0xf0]  ;;  %v850_v61 = vld [vmem:[%s1488_s1 + $0x130] sm:$0xf]  ;;  %v996_v62 = vld [vmem:[%s1488_s1 + $0x134] sm:$0xf0]  ;;  %v715_v63 = vor.u32 %v962_v55, %v714_v52  ;;  %v735_v1 = vor.u32 %v965_v56, %v732_v57 }
   0xf   :  { %v706_v0 = vld [vmem:[%s1488_s1 + $0x10] sm:$0xf]  ;;  %v779_v2 = vor.u32 %v978_v60, %v778_v59  ;;  %v960_v3 = vld [vmem:[%s1488_s1 + $0x14] sm:$0xf0]  ;;  %v963_v4 = vld [vmem:[%s1488_s1 + $0x34] sm:$0xf]  ;;  %v851_v6 = vor.u32 %v996_v62, %v850_v61 }
  0x10   :  { %346 = vmatpush.bf16.msra.mxu0 %v731_v38  ;;  %v724_v5 = vld [vmem:[%s1488_s1 + $0x38] sm:$0xf0]  ;;  %v770_v7 = vld [vmem:[%s1488_s1 + $0x90] sm:$0xf]  ;;  %v976_v8 = vld [vmem:[%s1488_s1 + $0x94] sm:$0xf0]  ;;  %v707_v14 = vor.u32 %v960_v3, %v706_v0 }
  0x11   :  { %359 = vmatpush.bf16.msra.mxu1 %v795_v40  ;;  %v842_v11 = vld [vmem:[%s1488_s1 + $0x120] sm:$0xf]  ;;  %v994_v12 = vld [vmem:[%s1488_s1 + $0x124] sm:$0xf0]  ;;  %v727_v16 = vor.u32 %v963_v4, %v724_v5  ;;  %v771_v17 = vor.u32 %v976_v8, %v770_v7  ;;  %v961_v20 = vld [vmem:[%s1488_s1 + $0x24] sm:$0xf] }
  0x12   :  { %371 = vmatpush.bf16.msra.mxu2 %v867_v45  ;;  %384 = vmatpush.bf16.msra.mxu3 %v743_v53  ;;  %v34_v13 = vld [vmem:[%s1487_s0] sm:$0x7]  ;;  %v958_v10 = vld [vmem:[%s1488_s1 + $0x4] sm:$0xf0]  ;;  %v716_v21 = vld [vmem:[%s1488_s1 + $0x28] sm:$0xf0]  ;;  %v843_v22 = vor.u32 %v994_v12, %v842_v11 }
  0x13   :  { %v698_v15 = vld [vmem:[%s1488_s1] sm:$0xf]  ;;  %89 = vst [vmem:[#allocation1] ss:$9 sm:$0xff] %v34_v13  ;;  %v974_v23 = vld [vmem:[%s1488_s1 + $0x84] sm:$0xf0]  ;;  %v719_v30 = vor.u32 %v961_v20, %v716_v21 }
  0x14   :  { %347 = vmatpush.bf16.msra.mxu0 %v723_v51  ;;  %v762_v18 = vld [vmem:[%s1488_s1 + $0x80] sm:$0xf]  ;;  %v987_v24 = vld [vmem:[%s1488_s1 + $0xf4] sm:$0xf]  ;;  %v820_v25 = vld [vmem:[%s1488_s1 + $0xf8] sm:$0xf0]  ;;  %v699_v29 = vor.u32 %v958_v10, %v698_v15 }
  0x15   :  { %360 = vmatpush.bf16.msra.mxu1 %v787_v54  ;;  %v834_v27 = vld [vmem:[%s1488_s1 + $0x110] sm:$0xf]  ;;  %v992_v28 = vld [vmem:[%s1488_s1 + $0x114] sm:$0xf0]  ;;  %v763_v31 = vor.u32 %v974_v23, %v762_v18  ;;  %v823_v32 = vor.u32 %v987_v24, %v820_v25  ;;  %v959_v33 = vld [vmem:[%s1488_s1 + $0x14] sm:$0xf] }
  0x16   :  { %372 = vmatpush.bf16.msra.mxu2 %v859_v58  ;;  %385 = vmatpush.bf16.msra.mxu3 %v735_v1  ;;  %v708_v34 = vld [vmem:[%s1488_s1 + $0x18] sm:$0xf0]  ;;  %v835_v35 = vor.u32 %v992_v28, %v834_v27  ;;  %v826_v37 = vld [vmem:[%s1488_s1 + $0x100] sm:$0xf]  ;;  %v985_v38 = vld [vmem:[%s1488_s1 + $0xe4] sm:$0xf] }
  0x17   :  { %v812_v39 = vld [vmem:[%s1488_s1 + $0xe8] sm:$0xf0]  ;;  %v990_v40 = vld [vmem:[%s1488_s1 + $0x104] sm:$0xf0]  ;;  %v1001_v19 = vld [vmem:[%s1488_s1 + $0x164] sm:$0xf]  ;;  %v711_v43 = vor.u32 %v959_v33, %v708_v34 }
  0x18   :  { %348 = vmatpush.bf16.msra.mxu0 %v715_v63  ;;  %v876_v41 = vld [vmem:[%s1488_s1 + $0x168] sm:$0xf0]  ;;  %v815_v44 = vor.u32 %v985_v38, %v812_v39  ;;  %v957_v46 = vld [vmem:[%s1488_s1 + $0x4] sm:$0xf]  ;;  %v827_v48 = vor.u32 %v990_v40, %v826_v37  ;;  %v983_v50 = vld [vmem:[%s1488_s1 + $0xd4] sm:$0xf] }
  0x19   :  { %361 = vmatpush.bf16.msra.mxu1 %v779_v2  ;;  %v700_v47 = vld [vmem:[%s1488_s1 + $0x8] sm:$0xf0]  ;;  %v879_v49 = vor.u32 %v1001_v19, %v876_v41  ;;  %v804_v51 = vld [vmem:[%s1488_s1 + $0xd8] sm:$0xf0]  ;;  %v999_v52 = vld [vmem:[%s1488_s1 + $0x154] sm:$0xf] }
  0x1a   :  { %373 = vmatpush.bf16.msra.mxu2 %v851_v6  ;;  %386 = vmatpush.bf16.msra.mxu3 %v727_v16  ;;  %v90_v42 = vld [vmem:[#allocation1] sm:$0xff]  ;;  %v1321_v45 = vld [vmem:[#allocation1 + $0x9] sm:$0xff]  ;;  %v868_v53 = vld [vmem:[%s1488_s1 + $0x158] sm:$0xf0]  ;;  %v703_v55 = vor.u32 %v957_v46, %v700_v47  ;;  %v807_v56 = vor.u32 %v983_v50, %v804_v51 }
  0x1b   :  { %v1010_v54 = vld [vmem:[%s1490_s3 + $0x38] sm:$0xff]  ;;  %v981_v57 = vld [vmem:[%s1488_s1 + $0xc4] sm:$0xf]  ;;  %v871_v59 = vor.u32 %v999_v52, %v868_v53  ;;  %v796_v60 = vld [vmem:[%s1488_s1 + $0xc8] sm:$0xf0] }
  0x1c   :  { %349 = vmatpush.bf16.msra.mxu0 %v707_v14  ;;  %v92_v58 = vld [vmem:[#allocation1 + $0x12] sm:$0xff] }
  0x1d   :  { %362 = vmatpush.bf16.msra.mxu1 %v771_v17 }
  0x1e   :  { %374 = vmatpush.bf16.msra.mxu2 %v843_v22  ;;  %387 = vmatpush.bf16.msra.mxu3 %v719_v30 }
  0x20   :  { %350 = vmatpush.bf16.msra.mxu0 %v699_v29 }
  0x21   :  { %363 = vmatpush.bf16.msra.mxu1 %v763_v31 }
  0x22   :  { %375 = vmatpush.bf16.msra.mxu2 %v835_v35  ;;  %388 = vmatpush.bf16.msra.mxu3 %v711_v43 }
  0x23   :  { %351 = vmatmul.bf16.vlgmr.msra.gmra.mxu0 %v90_v42 }
  0x24   :  { %395 = vmatpush.bf16.msrb.mxu0 %v823_v32  ;;  %364 = vmatmul.bf16.vlgmr.msra.gmra.mxu1 %v1321_v45 }
  0x25   :  { %408 = vmatpush.bf16.msrb.mxu1 %v341_v36 }
  0x26   :  { %376 = vmatpush.bf16.msra.mxu2 %v827_v48 }
  0x28   :  { %396 = vmatpush.bf16.msrb.mxu0 %v815_v44 }
  0x29   :  { %409 = vmatpush.bf16.msrb.mxu1 %v879_v49 }
  0x2a   :  { %14 = vsyncpa [#allocation3], 0  ;;  %v997_v61 = vld [vmem:[%s1488_s1 + $0x144] sm:$0xf]  ;;  %v860_v62 = vld [vmem:[%s1488_s1 + $0x148] sm:$0xf0]  ;;  %508 = vmatpush.bf16.msrb.mxu2 %v1010_v54  ;;  %389 = vmatpush.bf16.msra.mxu3 %v703_v55  ;;  %v799_v0 = vor.u32 %v981_v57, %v796_v60 }
  0x2b   :  { %v1009_v63 = vld [vmem:[%s1490_s3 + $0x30] sm:$0xff]  ;;  %880 = vmatmul.msk.bf16.vlgmr.msra.gmra.mxu2 %vm330_vm2, %v92_v58  ;;  %v863_v1 = vor.u32 %v997_v61, %v860_v62  ;;  %v788_v3 = vld [vmem:[%s1488_s1 + $0xb8] sm:$0xf0]  ;;  %v1008_v6 = vld [vmem:[%s1490_s3 + $0x28] sm:$0xff]  ;;  %vm504_vm3 = vcmask 1045504   ;;  %vm500_vm4 = vcmask 97280  }
  0x2c   :  { %397 = vmatpush.bf16.msrb.mxu0 %v807_v56  ;;  %v979_v2 = vld [vmem:[%s1488_s1 + $0xb4] sm:$0xf]  ;;  %v852_v5 = vld [vmem:[%s1488_s1 + $0x138] sm:$0xf0]  ;;  %v977_v9 = vld [vmem:[%s1488_s1 + $0xa4] sm:$0xf] }
  0x2d   :  { %410 = vmatpush.bf16.msrb.mxu1 %v871_v59  ;;  %390 = vmatmul.bf16.vlgmr.msra.gmra.mxu3 %v90_v42  ;;  %v995_v4 = vld [vmem:[%s1488_s1 + $0x134] sm:$0xf]  ;;  %v791_v7 = vor.u32 %v979_v2, %v788_v3  ;;  %v780_v11 = vld [vmem:[%s1488_s1 + $0xa8] sm:$0xf0]  ;;  %v993_v12 = vld [vmem:[%s1488_s1 + $0x124] sm:$0xf] }
  0x2e   :  { %509 = vmatpush.bf16.msrb.mxu2 %v1009_v63  ;;  %v855_v8 = vor.u32 %v995_v4, %v852_v5  ;;  %v844_v13 = vld [vmem:[%s1488_s1 + $0x128] sm:$0xf0]  ;;  %v1007_v14 = vld [vmem:[%s1490_s3 + $0x20] sm:$0xff]  ;;  %v783_v15 = vor.u32 %v977_v9, %v780_v11  ;;  %v975_v16 = vld [vmem:[%s1488_s1 + $0x94] sm:$0xf]  ;;  %vm596_vm5 = vcmask 1041408  }
  0x2f   :  { %v847_v10 = vor.u32 %v993_v12, %v844_v13  ;;  %v772_v17 = vld [vmem:[%s1488_s1 + $0x98] sm:$0xf0]  ;;  %v991_v18 = vld [vmem:[%s1488_s1 + $0x114] sm:$0xf]  ;;  %v973_v24 = vld [vmem:[%s1488_s1 + $0x84] sm:$0xf] }
  0x30   :  { %398 = vmatpush.bf16.msrb.mxu0 %v799_v0  ;;  %v836_v20 = vld [vmem:[%s1488_s1 + $0x118] sm:$0xf0]  ;;  %v775_v22 = vor.u32 %v975_v16, %v772_v17  ;;  %v764_v25 = vld [vmem:[%s1488_s1 + $0x88] sm:$0xf0]  ;;  %v989_v26 = vld [vmem:[%s1488_s1 + $0x104] sm:$0xf] }
  0x31   :  { %411 = vmatpush.bf16.msrb.mxu1 %v863_v1  ;;  %v1006_v21 = vld [vmem:[%s1490_s3 + $0x18] sm:$0xff]  ;;  %v839_v23 = vor.u32 %v991_v18, %v836_v20  ;;  %v828_v27 = vld [vmem:[%s1488_s1 + $0x108] sm:$0xf0]  ;;  %v767_v28 = vor.u32 %v973_v24, %v764_v25  ;;  %v1005_v30 = vld [vmem:[%s1490_s3 + $0x10] sm:$0xff]  ;;  %vm592_vm6 = vcmask 818176   ;;  %vm647_vm7 = vcmask 441344  }
  0x32   :  { %510 = vmatpush.bf16.msrb.mxu2 %v1008_v6  ;;  %v831_v29 = vor.u32 %v989_v26, %v828_v27  ;;  %v1004_v31 = vld [vmem:[%s1490_s3 + $0x8] sm:$0xff]  ;;  %v1003_v32 = vld [vmem:[%s1490_s3] sm:$0xff]  ;;  %v548_v61 = vld [vmem:[%s1492_s5 + $0x30] sm:$0x3]  ;;  %vm667_vm8 = vcmask 66560   ;;  %s687_s24 = sshll.u32 %s1496_s9, 4  ;;  %s688_s24 = int_to_ptr.hbm [resolvable:$true] %s687_s24 }
  0x33   :  { %v916_v33 = vld [vmem:[%s1490_s3 + $0x40] sm:$0xf]  ;;  %v1011_v34 = vld [vmem:[%s1490_s3 + $0x40] sm:$0x30]  ;;  %v578_v62 = vunpack.c.l.b16 %v548_v61  ;;  %v1017_v1 = vld [vmem:[%s1492_s5 + $0x28] sm:$0xff] }
  0x34   :  { %399 = vmatpush.bf16.msrb.mxu0 %v791_v7  ;;  %v917_v35 = vor.u32 %v1011_v34, %v916_v33  ;;  %v82_v37 = vld [vmem:[%s1489_s2] sm:$0x3]  ;;  %v1015_v3 = vld [vmem:[%s1492_s5 + $0x18] sm:$0xff]  ;;  %v1014_v4 = vld [vmem:[%s1492_s5 + $0x10] sm:$0xff] }
  0x35   :  { %412 = vmatpush.bf16.msrb.mxu1 %v855_v8  ;;  %v84_v39 = vperm.slane %v82_v37, 0  ;;  %v85_v50 = vperm.slane %v82_v37, 1  ;;  %v585_v63 = vpack.c.b16 %v578_v62, %v578_v62  ;;  %v1016_v2 = vld [vmem:[%s1492_s5 + $0x20] sm:$0xff]  ;;  %v1013_v5 = vld [vmem:[%s1492_s5 + $0x8] sm:$0xff]  ;;  %v621_v7 = vld [vmem:[%s1494_s7 + $0x18] sm:$0x7] }
  0x36   :  { %511 = vmatpush.bf16.msrb.mxu2 %v1007_v14  ;;  %v506_v36 = vsel %vm504_vm3, %v917_v35, 0  ;;  %v1012_v6 = vld [vmem:[%s1492_s5] sm:$0xff]  ;;  %v639_v8 = vunpack.c.l.b16 %v621_v7  ;;  %v1020_v13 = vld [vmem:[%s1494_s7 + $0x10] sm:$0xff]  ;;  %v1019_v14 = vld [vmem:[%s1494_s7 + $0x8] sm:$0xff] }
  0x37   :  { %528 = vmatpush.bf16.msrb.mxu3 %v506_v36  ;;  %v598_v0 = vsel %vm596_vm5, %v585_v63, 0  ;;  %v1024_v24 = vld [vmem:[%s1493_s6] ss:$0 sm:$0xff]  ;;  %s1057_s6 = smov [#allocation2]  }
  0x38   :  { %400 = vmatpush.bf16.msrb.mxu0 %v783_v15  ;;  %v643_v9 = vpack.c.b16 %v639_v8, %v639_v8 }
  0x39   :  { %413 = vmatpush.bf16.msrb.mxu1 %v847_v10  ;;  %v1023_v10 = vld [vmem:[%s1491_s4] ss:$0 sm:$0xff] }
  0x3a   :  { %512 = vmatpush.bf16.msrb.mxu2 %v1006_v21  ;;  %v652_v12 = vsel %vm333_vm0, %v643_v9, 0 }
  0x3b   :  { %601 = vmatpush.bf16.msra.mxu3 %v598_v0 }
  0x3c   :  { %401 = vmatpush.bf16.msrb.mxu0 %v775_v22 }
  0x3d   :  { %414 = vmatpush.bf16.msrb.mxu1 %v839_v23  ;;  %v1018_v23 = vld [vmem:[%s1494_s7] sm:$0xff]  ;;  %s685_s7 = sshll.u32 %s1057_s6, 4  ;;  %s686_s7 = int_to_ptr.vmem [resolvable:$true] %s685_s7 }
  0x3e   :  { %513 = vmatpush.bf16.msrb.mxu2 %v1005_v30  ;;  %v1025_v30 = vld [vmem:[%s1495_s8] ss:$0 sm:$0xff] }
  0x3f   :  { %602 = vmatpush.bf16.msra.mxu3 %v1017_v1 }
  0x40   :  { %402 = vmatpush.bf16.msrb.mxu0 %v767_v28 }
  0x41   :  { %415 = vmatpush.bf16.msrb.mxu1 %v831_v29 }
  0x42   :  { %514 = vmatpush.bf16.msrb.mxu2 %v1004_v31 }
  0x43   :  { %403 = vmatmul.bf16.vlgmr.msrb.gmra.mxu0 %v1321_v45  ;;  %603 = vmatpush.bf16.msra.mxu3 %v1016_v2 }
  0x44   :  { %881 = vmatmul.msk.bf16.vlgmr.msrb.gmra.mxu1 %vm330_vm2, %v92_v58  ;;  %658 = vmatpush.bf16.msra.mxu0 %v652_v12 }
  0x46   :  { %515 = vmatpush.bf16.msrb.mxu2 %v1003_v32 }
  0x47   :  { %604 = vmatpush.bf16.msra.mxu3 %v1015_v3 }
  0x48   :  { %659 = vmatpush.bf16.msra.mxu0 %v1020_v13 }
  0x4b   :  { %605 = vmatpush.bf16.msra.mxu3 %v1014_v4 }
  0x4c   :  { %660 = vmatpush.bf16.msra.mxu0 %v1019_v14 }
  0x4f   :  { %606 = vmatpush.bf16.msra.mxu3 %v1013_v5 }
  0x50   :  { %661 = vmatpush.bf16.msra.mxu0 %v1018_v23 }
  0x53   :  { %607 = vmatpush.bf16.msra.mxu3 %v1012_v6 }
  0xa0   :  { %v352_v38 = vpop.f32.mrf.mxu0 }
  0xa1   :  { %v365_v40 = vpop.f32.mrf.mxu1  ;;  %v353_v19 = vadd.f32 %v352_v38, %v84_v39 }
  0xa3   :  { %v366_v42 = vadd.f32 %v365_v40, %v353_v19 }
  0xa8   :  { %v354_v41 = vpop.f32.mrf.mxu0 }
  0xa9   :  { %v367_v43 = vpop.f32.mrf.mxu1 }
  0xae   :  { %v378_v44 = vpop.f32.mrf.mxu2 }
  0xaf   :  { %v379_v45 = vadd.f32 %v378_v44, %v366_v42 }
  0xb0   :  { %v391_v46 = vpop.f32.mrf.mxu3 }
  0xb1   :  { %v421_v47 = vmax.f32 %v379_v45, 0.0  ;;  %v392_v52 = vadd.f32 %v391_v46, %v85_v50 }
  0xb3   :  { %v423_v48 = vpack.c.bf16 %v421_v47, %v421_v47 }
  0xb5   :  { %516 = vmatmul.bf16.vlgmr.msrb.gmra.mxu2 %v423_v48 }
  0xb6   :  { %v380_v49 = vpop.f32.mrf.mxu2 }
  0xb8   :  { %v393_v51 = vpop.f32.mrf.mxu3 }
  0xc0   :  { %v404_v53 = vpop.f32.mrf.mxu0 }
  0xc1   :  { %v405_v54 = vadd.f32 %v404_v53, %v392_v52  ;;  %v417_v55 = vpop.f32.mrf.mxu1 }
  0xc3   :  { %v418_v56 = vadd.f32 %v417_v55, %v405_v54 }
  0xc5   :  { %v422_v57 = vmax.f32 %v418_v56, 0.0 }
  0xc7   :  { %v424_v58 = vpack.c.bf16 %v422_v57, %v422_v57 }
  0xc8   :  { %v406_v59 = vpop.f32.mrf.mxu0 }
  0xc9   :  { %v419_v60 = vpop.f32.mrf.mxu1  ;;  %918 = vmatmul.msk.bf16.vlgmr.msrb.gmra.mxu3 %vm500_vm4, %v424_v58 }
 0x138   :  { %v517_v11 = vpop.f32.mrf.mxu2 }
 0x139   :  { %v518_v16 = vadd.f32 %v1023_v10, %v517_v11 }
 0x140   :  { %v519_v15 = vpop.f32.mrf.mxu2 }
 0x14c   :  { %v530_v17 = vpop.f32.mrf.mxu3 }
 0x14d   :  { %v531_v18 = vadd.f32 %v530_v17, %v518_v16 }
 0x14f   :  { %v534_v20 = vmax.f32 %v531_v18, 0.0 }
 0x151   :  { %v535_v21 = vpack.c.bf16 %v534_v20, %v534_v20 }
 0x153   :  { %943 = vmatmul.msk.bf16.vlgmr.msra.gmra.mxu3 %vm592_vm6, %v535_v21 }
 0x154   :  { %v532_v22 = vpop.f32.mrf.mxu3 }
 0x1d6   :  { %v609_v25 = vpop.f32.mrf.mxu3 }
 0x1d7   :  { %v610_v26 = vadd.f32 %v1024_v24, %v609_v25 }
 0x1d9   :  { %v613_v27 = vmax.f32 %v610_v26, 0.0 }
 0x1db   :  { %v614_v28 = vpack.c.bf16 %v613_v27, %v613_v27 }
 0x1dd   :  { %956 = vmatmul.msk.bf16.vlgmr.msra.gmra.mxu0 %vm647_vm7, %v614_v28 }
 0x1de   :  { %v611_v29 = vpop.f32.mrf.mxu3 }
 0x25a   :  { %v663_v31 = vpop.f32.mrf.mxu0 }
 0x25b   :  { %v664_v32 = vadd.f32 %v1025_v30, %v663_v31 }
 0x25d   :  { %v668_v33 = vsel %vm667_vm8, %v664_v32, -inf }
 0x25e   :  { %669 = vmax.xlane.f32.xlu0 %v668_v33 }
 0x262   :  { %v665_v34 = vpop.f32.mrf.mxu0 }
 0x2d1   :  { %v670_v35 = vpop.xlane.xlu0 %669 }
 0x2d2   :  { %v671_v36 = vsub.f32 %v664_v32, %v670_v35 }
 0x2d4   :  { %v672_v37 = vmul.f32 1.442695, %v671_v36 }
 0x2d6   :  { %1026 = vpow2.f32 %v672_v37 }
 0x2dc   :  { %v1027_v38 = vpop.eup %1026 }
 0x2dd   :  { %v674_v39 = vsel %vm667_vm8, %v1027_v38, 0.0 }
 0x2de   :  { %675 = vadd.xlane.f32.xlu0 %v674_v39 }
 0x351   :  { %v676_v40 = vpop.xlane.xlu0 %675 }
 0x352   :  { %1028 = vrcp.f32 %v676_v40 }
 0x358   :  { %v1029_v19 = vpop.eup %1028 }
 0x359   :  { %v678_v41 = vmul.f32 %v1029_v19, %v1027_v38 }
 0x35b   :  { %679 = vst.msk [vmem:[#allocation2] sm:$0x3] %vm667_vm8, %v678_v41 }
 0x35c   :  { %690 = dma.vmem_to_hbm [thread:$0]  %s686_s7, 32, %s688_s24, [#allocation3]  }
 0x35d   :  { %1054 = dma.done.wait [#allocation3], 32  }
 0x35e   :  { %1055 = vsyncadd [#allocation3], 4294967264 }
 0x35f   :  { %695 = vsyncpa [#allocation3], 1 }

</bundles_post_ra>
